<compile_context>
chip_gen: v6e
topology: v6e:2x2x1
jax: 0.10.0
libtpu: 0.0.40
codegen_flags: <defaults>
</compile_context>

<pallas_src>
import functools
import math

import jax
import jax.numpy as jnp
from jax.experimental import pallas as pl
from jax.experimental.pallas import tpu as pltpu


# --------------------------------------------------------------------------------------
# Kernel
# --------------------------------------------------------------------------------------
def _attn_mem_kernel(q_ref, k_ref, v_ref, g_ref,
                     wq_ref, bq_ref, wk_ref, bk_ref, wg_ref, bg_ref,
                     wv_ref, bv_ref, wo_ref, bo_ref,
                     out_ref, obuf_ref, *, h, d_k, d_v):
    # TODO(synk): attention_mask (b_s, h, nq, nk) masking path is not implemented (mask=None only).
    f32 = jnp.float32
    BB, nq, d_model = q_ref.shape
    nk = k_ref.shape[1]
    ng = g_ref.shape[1]
    d_out = wo_ref.shape[1]
    cdt = wq_ref.dtype                       # compute dtype (bf16 by default, MXU-native)

    # Flatten the batch block into rows so each projection is one wide GEMM.
    q_act = q_ref[...].reshape(BB * nq, d_model)
    k_act = k_ref[...].reshape(BB * nk, d_model)
    v_act = v_ref[...].reshape(BB * nk, d_model)
    g_act = g_ref[...].reshape(BB * ng, d_model)

    # Head-fused projections (scale already folded into wq/bq); gk & gv share one GEMM.
    q_all = (jnp.dot(q_act, wq_ref[...], preferred_element_type=f32) + bq_ref[...]).astype(cdt)
    k_all = (jnp.dot(k_act, wk_ref[...], preferred_element_type=f32) + bk_ref[...]).astype(cdt)
    v_all = (jnp.dot(v_act, wv_ref[...], preferred_element_type=f32) + bv_ref[...]).astype(cdt)
    g_all = (jnp.dot(g_act, wg_ref[...], preferred_element_type=f32) + bg_ref[...]).astype(cdt)

    q_all = q_all.reshape(BB, nq, h * d_k)
    k_all = k_all.reshape(BB, nk, h * d_k)
    v_all = v_all.reshape(BB, nk, h * d_v)
    gk_all = g_all[:, : h * d_k].reshape(BB, ng, h * d_k)
    gv_all = g_all[:, h * d_k:].reshape(BB, ng, h * d_v)

    # Static loop over heads (h is small); per-head tensors are lane slices (XLU has slack).
    for hi in range(h):
        q_h = q_all[:, :, hi * d_k:(hi + 1) * d_k]
        k_h = k_all[:, :, hi * d_k:(hi + 1) * d_k]
        gk_h = gk_all[:, :, hi * d_k:(hi + 1) * d_k]
        v_h = v_all[:, :, hi * d_v:(hi + 1) * d_v]
        gv_h = gv_all[:, :, hi * d_v:(hi + 1) * d_v]

        # Scores for the real keys and the grid-memory keys, computed directly from the
        # projection outputs (no KV scratch round trip); the softmax is joint across both.
        s_k = jnp.einsum('bqd,bkd->bqk', q_h, k_h, preferred_element_type=f32)
        s_g = jnp.einsum('bqd,bgd->bqg', q_h, gk_h, preferred_element_type=f32)

        m = jnp.maximum(jnp.max(s_k, axis=-1, keepdims=True),
                        jnp.max(s_g, axis=-1, keepdims=True))
        e_k = jnp.exp(s_k - m)
        e_g = jnp.exp(s_g - m)
        denom = (jnp.sum(e_k, axis=-1, keepdims=True)
                 + jnp.sum(e_g, axis=-1, keepdims=True))
        inv = pl.reciprocal(denom, approx=True)          # EUP, off the VALU divide path
        inv = inv * (2.0 - denom * inv)                  # one Newton step -> ~f32 accuracy
        p_k = (e_k * inv).astype(cdt)
        p_g = (e_g * inv).astype(cdt)

        o_h = (jnp.einsum('bqk,bkd->bqd', p_k, v_h, preferred_element_type=f32)
               + jnp.einsum('bqg,bgd->bqd', p_g, gv_h, preferred_element_type=f32))

        # Stage this head's output; fc_o is applied once after the loop as a single wide GEMM.
        obuf_ref[:, hi * d_v:(hi + 1) * d_v] = o_h.reshape(BB * nq, d_v).astype(cdt)

    out = jnp.dot(obuf_ref[...], wo_ref[...], preferred_element_type=f32) + bo_ref[...]
    out_ref[...] = out.reshape(BB, nq, d_out).astype(out_ref.dtype)


# --------------------------------------------------------------------------------------
# Parameters (PyTorch layout: weight (out_features, in_features), bias (1, out_features))
# --------------------------------------------------------------------------------------
def init_params(key, d_model, d_k, d_v, h):
    """Deterministic xavier_uniform weights, zero biases (matches init_weights)."""
    def xavier(key, out_f, in_f):
        a = math.sqrt(6.0 / (in_f + out_f))
        return jax.random.uniform(key, (out_f, in_f), jnp.float32, minval=-a, maxval=a)

    ks = jax.random.split(key, 6)
    return {
        "wq": xavier(ks[0], h * d_k, d_model), "bq": jnp.zeros((1, h * d_k), jnp.float32),
        "wk": xavier(ks[1], h * d_k, d_model), "bk": jnp.zeros((1, h * d_k), jnp.float32),
        "wgk": xavier(ks[2], h * d_k, d_model), "bgk": jnp.zeros((1, h * d_k), jnp.float32),
        "wv": xavier(ks[3], h * d_v, d_model), "bv": jnp.zeros((1, h * d_v), jnp.float32),
        "wgv": xavier(ks[4], h * d_v, d_model), "bgv": jnp.zeros((1, h * d_v), jnp.float32),
        "wo": xavier(ks[5], d_model, h * d_v), "bo": jnp.zeros((1, d_model), jnp.float32),
    }


def _relayout_weights(params, *, d_k, d_v, h, d_model, d_out, compute_dtype):
    """One-time host-side re-layout: head-fused, pre-transposed, bf16; scale folded into fc_q."""
    scale = 1.0 / math.sqrt(d_k)
    f32 = jnp.float32
    wq = (params["wq"].astype(f32).T * scale).astype(compute_dtype)          # (d_model, h*d_k)
    bq = params["bq"].astype(f32) * scale                                    # (1, h*d_k)
    wk = params["wk"].astype(f32).T.astype(compute_dtype)                    # (d_model, h*d_k)
    bk = params["bk"].astype(f32)
    wv = params["wv"].astype(f32).T.astype(compute_dtype)                    # (d_model, h*d_v)
    bv = params["bv"].astype(f32)
    # gk and gv share the key_grid input -> fuse into a single GEMM weight.
    wg = jnp.concatenate([params["wgk"].astype(f32).T,
                          params["wgv"].astype(f32).T], axis=1).astype(compute_dtype)
    bg = jnp.concatenate([params["bgk"], params["bgv"]], axis=1).astype(f32)
    # fc_o: pad output features to d_out (lane-dense stores), pre-transpose to (h*d_v, d_out).
    wo = jnp.pad(params["wo"].astype(f32),
                 ((0, d_out - d_model), (0, 0))).T.astype(compute_dtype)     # (h*d_v, d_out)
    bo = jnp.pad(params["bo"].astype(f32), ((0, 0), (0, d_out - d_model)))   # (1, d_out)
    # Biases stay f32 (tiny; added to the f32 GEMM accumulators).
    return [wq, bq, wk, bk, wg, bg, wv, bv, wo, bo]


# --------------------------------------------------------------------------------------
# VMEM budgeting / batch blocking (generation-aware)
# --------------------------------------------------------------------------------------
def _vmem_capacity_bytes():
    try:
        return int(pltpu.get_tpu_info().vmem_capacity_bytes)
    except Exception:
        return 64 * 1024 * 1024          # conservative default (v7x per-TensorCore VMEM)


def _pick_batch_block(b_s, rows_per_batch, per_batch_bytes, budget_bytes, target_rows):
    """Largest divisor of b_s that leaves >= 2 grid steps when possible, keeps the per-step
    GEMM row count <= target_rows, and fits the per-step VMEM budget."""
    bb_cap = max(1, b_s // 2)            # >= 2 grid steps -> pipelining + both v7x TensorCores
    best = 1
    for bb in range(1, bb_cap + 1):
        if b_s % bb:
            continue
        if bb * rows_per_batch > target_rows:
            continue
        if bb * per_batch_bytes > budget_bytes:
            continue
        best = bb
    return best


def _const_index_map(ndim):
    def im(b):
        return (0,) * ndim
    return im


# --------------------------------------------------------------------------------------
# Wrapper
# --------------------------------------------------------------------------------------
def scaled_dot_product_attention_memory(params, queries, keys, values,
                                        key_grid, value_grid=None, *,
                                        d_k, d_v, h,
                                        compute_dtype=jnp.bfloat16):
    # TODO(synk): attention_mask path not implemented (mask=None only).
    if key_grid.ndim == 2:
        key_grid = key_grid[:, None, :]
        if value_grid is not None and value_grid.ndim == 2:
            value_grid = value_grid[:, None, :]
    # value_grid is intentionally unused: the reference forward computes gv from key_grid.

    out_dtype = queries.dtype
    b_s, nq, d_model = queries.shape
    nk = keys.shape[1]
    ng = key_grid.shape[1]

    # Lane-dense output: pad fc_o's output dim only when d_model is not a multiple of 128.
    d_out = ((d_model + 127) // 128) * 128

    weights = _relayout_weights(params, d_k=d_k, d_v=d_v, h=h, d_model=d_model,
                                d_out=d_out, compute_dtype=compute_dtype)

    # Activations flow through the kernel at the compute dtype (halves DMA for f32 callers).
    q_in = queries.astype(compute_dtype)
    k_in = keys.astype(compute_dtype)
    v_in = values.astype(compute_dtype)
    g_in = key_grid.astype(compute_dtype)

    # ---- generation-aware VMEM budget + batch blocking ----
    capacity = _vmem_capacity_bytes()
    budget = min(int(0.80 * capacity), 100 * 1024 * 1024)
    target_rows = 1024 if capacity >= (100 << 20) else 512

    c_item = jnp.dtype(compute_dtype).itemsize
    o_item = jnp.dtype(out_dtype).itemsize
    w_bytes = sum(int(w.size) * w.dtype.itemsize for w in weights)
    act_b = (nq + 2 * nk + ng) * d_model * c_item                      # pipelined input blocks
    out_b = nq * d_out * o_item                                        # pipelined output block
    inter_b = ((nq + nk) * h * d_k + nk * h * d_v + ng * h * (d_k + d_v)) * c_item \
              + nq * (nk + ng) * 4 + nq * d_out * 4                    # in-kernel intermediates
    obuf_b = nq * h * d_v * c_item                                     # staged head outputs
    per_batch = 2 * (act_b + out_b) + obuf_b + 2 * inter_b
    fixed = 2 * w_bytes + (4 << 20)                                    # weights (worst case) + margin

    BB = _pick_batch_block(b_s, max(nq, nk + ng), per_batch,
                           max(budget - fixed, 1 << 20), target_rows)
    need = fixed + BB * per_batch
    vmem_limit = int(max(16 << 20, min(need, budget)))

    act_specs = [
        pl.BlockSpec((BB, nq, d_model), lambda b: (b, 0, 0)),
        pl.BlockSpec((BB, nk, d_model), lambda b: (b, 0, 0)),
        pl.BlockSpec((BB, nk, d_model), lambda b: (b, 0, 0)),
        pl.BlockSpec((BB, ng, d_model), lambda b: (b, 0, 0)),
    ]
    out_spec = pl.BlockSpec((BB, nq, d_out), lambda b: (b, 0, 0))
    scratch = [pltpu.VMEM((BB * nq, h * d_v), compute_dtype)]

    kernel = functools.partial(_attn_mem_kernel, h=h, d_k=d_k, d_v=d_v)

    def _run(weight_pipeline_mode):
        def wspec(w):
            if weight_pipeline_mode is None:
                return pl.BlockSpec(w.shape, _const_index_map(w.ndim))
            return pl.BlockSpec(w.shape, _const_index_map(w.ndim),
                                pipeline_mode=weight_pipeline_mode)

        weight_specs = [wspec(w) for w in weights]
        return pl.pallas_call(
            kernel,
            out_shape=jax.ShapeDtypeStruct((b_s, nq, d_out), out_dtype),
            grid_spec=pltpu.PrefetchScalarGridSpec(
                num_scalar_prefetch=0,
                grid=(b_s // BB,),
                in_specs=act_specs + weight_specs,
                out_specs=out_spec,
                scratch_shapes=scratch,
            ),
            compiler_params=pltpu.CompilerParams(
                dimension_semantics=("parallel",),   # batch axis independent -> megacore sharding
                vmem_limit_bytes=vmem_limit,
            ),
        )(q_in, k_in, v_in, g_in, *weights)

    try:
        # Grid-invariant weights: single-buffered to halve their VMEM residency (matters on v7x).
        out = _run(pl.Buffered(1))
    except Exception:
        # TODO(synk): pl.Buffered(1) on resident weights not supported by this jax/libtpu ->
        #             fall back to default (double) buffering.
        out = _run(None)

    return out[..., :d_model] if d_out != d_model else out


# --------------------------------------------------------------------------------------
# Pure-JAX reference (transcription of the PyTorch forward, mask=None) for validation
# --------------------------------------------------------------------------------------
def _reference_forward(params, queries, keys, values, key_grid, *, d_k, d_v, h):
    if key_grid.ndim == 2:
        key_grid = key_grid[:, None, :]
    b_s, nq, d_model = queries.shape

    def lin(x, w, b):
        return x @ w.T + b

    k = lin(keys, params["wk"], params["bk"])
    gk = lin(key_grid, params["wgk"], params["bgk"])
    k_new = jnp.concatenate([k, gk], axis=1)
    k_new = k_new.reshape(b_s, k_new.shape[1], h, d_k).transpose(0, 2, 3, 1)

    v = lin(values, params["wv"], params["bv"])
    gv = lin(key_grid, params["wgv"], params["bgv"])
    v_new = jnp.concatenate([v, gv], axis=1)
    v_new = v_new.reshape(b_s, v_new.shape[1], h, d_v).transpose(0, 2, 1, 3)

    q = lin(queries, params["wq"], params["bq"]).reshape(b_s, nq, h, d_k).transpose(0, 2, 1, 3)
    att = jnp.matmul(q, k_new) / math.sqrt(d_k)
    att = jax.nn.softmax(att, axis=-1)
    out = jnp.matmul(att, v_new).transpose(0, 2, 1, 3).reshape(b_s, nq, h * d_v)
    return lin(out, params["wo"], params["bo"])


if __name__ == "__main__":
    d_model, d_k, d_v, h = 32, 16, 16, 2
    b_s, nq, nk = 2, 8, 8

    root = jax.random.PRNGKey(0)
    k_par, k_q, k_k, k_v, k_g, k_vg = jax.random.split(root, 6)

    params = init_params(k_par, d_model, d_k, d_v, h)
    queries = jax.random.normal(k_q, (b_s, nq, d_model), jnp.float32)
    keys = jax.random.normal(k_k, (b_s, nk, d_model), jnp.float32)
    values = jax.random.normal(k_v, (b_s, nk, d_model), jnp.float32)
    key_grid = jax.random.normal(k_g, (b_s, d_model), jnp.float32)     # 2-D -> unsqueeze path
    value_grid = jax.random.normal(k_vg, (b_s, d_model), jnp.float32)  # unused by forward (as in PyTorch)

    out = scaled_dot_product_attention_memory(
        params, queries, keys, values, key_grid, value_grid,
        d_k=d_k, d_v=d_v, h=h)
    out = jax.block_until_ready(out)

    ref = _reference_forward(params, queries, keys, values, key_grid,
                             d_k=d_k, d_v=d_v, h=h)
    assert out.shape == (b_s, nq, d_model)
    # Tolerance relaxed vs the f32 reference because the kernel computes its GEMMs in bf16
    # (MXU-native) with f32 accumulation, and normalizes with the EUP approximate reciprocal
    # (+ one Newton step).
    assert jnp.allclose(out, ref, atol=7e-2, rtol=7e-2), "mismatch vs JAX reference"

    print("KERNEL_OK")
</pallas_src>

<mosaic_0001>
module attributes {stable_mosaic.version = 11 : i64} {
  func.func @_attn_mem_kernel(%arg0: i32, %arg1: memref<1x8x32xbf16, #tpu.memory_space<vmem>>, %arg2: memref<1x8x32xbf16, #tpu.memory_space<vmem>>, %arg3: memref<1x8x32xbf16, #tpu.memory_space<vmem>>, %arg4: memref<1x1x32xbf16, #tpu.memory_space<vmem>>, %arg5: memref<32x32xbf16, #tpu.memory_space<vmem>>, %arg6: memref<1x32xf32, #tpu.memory_space<vmem>>, %arg7: memref<32x32xbf16, #tpu.memory_space<vmem>>, %arg8: memref<1x32xf32, #tpu.memory_space<vmem>>, %arg9: memref<32x64xbf16, #tpu.memory_space<vmem>>, %arg10: memref<1x64xf32, #tpu.memory_space<vmem>>, %arg11: memref<32x32xbf16, #tpu.memory_space<vmem>>, %arg12: memref<1x32xf32, #tpu.memory_space<vmem>>, %arg13: memref<32x128xbf16, #tpu.memory_space<vmem>>, %arg14: memref<1x128xf32, #tpu.memory_space<vmem>>, %arg15: memref<1x8x128xf32, #tpu.memory_space<vmem>>, %arg16: memref<8x32xbf16, #tpu.memory_space<vmem>>) attributes {dimension_semantics = [#tpu.dimension_semantics<parallel>], iteration_bounds = array<i64: 2>, scalar_prefetch = 0 : i64, scratch_operands = 1 : i64, tpu.core_type = #tpu.core_type<tc>, window_params = [{transform_indices = @transform_0, window_bounds = array<i64: 1, 8, 32>}, {transform_indices = @transform_1, window_bounds = array<i64: 1, 8, 32>}, {transform_indices = @transform_2, window_bounds = array<i64: 1, 8, 32>}, {transform_indices = @transform_3, window_bounds = array<i64: 1, 1, 32>}, {pipeline_mode = #tpu.pipeline_mode<synchronous>, transform_indices = @transform_4, window_bounds = array<i64: 32, 32>}, {pipeline_mode = #tpu.pipeline_mode<synchronous>, transform_indices = @transform_5, window_bounds = array<i64: 1, 32>}, {pipeline_mode = #tpu.pipeline_mode<synchronous>, transform_indices = @transform_6, window_bounds = array<i64: 32, 32>}, {pipeline_mode = #tpu.pipeline_mode<synchronous>, transform_indices = @transform_7, window_bounds = array<i64: 1, 32>}, {pipeline_mode = #tpu.pipeline_mode<synchronous>, transform_indices = @transform_8, window_bounds = array<i64: 32, 64>}, {pipeline_mode = #tpu.pipeline_mode<synchronous>, transform_indices = @transform_9, window_bounds = array<i64: 1, 64>}, {pipeline_mode = #tpu.pipeline_mode<synchronous>, transform_indices = @transform_10, window_bounds = array<i64: 32, 32>}, {pipeline_mode = #tpu.pipeline_mode<synchronous>, transform_indices = @transform_11, window_bounds = array<i64: 1, 32>}, {pipeline_mode = #tpu.pipeline_mode<synchronous>, transform_indices = @transform_12, window_bounds = array<i64: 32, 128>}, {pipeline_mode = #tpu.pipeline_mode<synchronous>, transform_indices = @transform_13, window_bounds = array<i64: 1, 128>}, {transform_indices = @transform_14, window_bounds = array<i64: 1, 8, 128>}]} {
    %c0 = arith.constant 0 : index
    %c0_0 = arith.constant 0 : index
    %c0_1 = arith.constant 0 : index
    %0 = vector.load %arg1[%c0, %c0_0, %c0_1] : memref<1x8x32xbf16, #tpu.memory_space<vmem>>, vector<1x8x32xbf16>
    %1 = vector.shape_cast %0 : vector<1x8x32xbf16> to vector<8x32xbf16>
    %c0_2 = arith.constant 0 : index
    %c0_3 = arith.constant 0 : index
    %c0_4 = arith.constant 0 : index
    %2 = vector.load %arg2[%c0_2, %c0_3, %c0_4] : memref<1x8x32xbf16, #tpu.memory_space<vmem>>, vector<1x8x32xbf16>
    %3 = vector.shape_cast %2 : vector<1x8x32xbf16> to vector<8x32xbf16>
    %c0_5 = arith.constant 0 : index
    %c0_6 = arith.constant 0 : index
    %c0_7 = arith.constant 0 : index
    %4 = vector.load %arg3[%c0_5, %c0_6, %c0_7] : memref<1x8x32xbf16, #tpu.memory_space<vmem>>, vector<1x8x32xbf16>
    %5 = vector.shape_cast %4 : vector<1x8x32xbf16> to vector<8x32xbf16>
    %c0_8 = arith.constant 0 : index
    %c0_9 = arith.constant 0 : index
    %c0_10 = arith.constant 0 : index
    %6 = vector.load %arg4[%c0_8, %c0_9, %c0_10] : memref<1x1x32xbf16, #tpu.memory_space<vmem>>, vector<1x1x32xbf16>
    %7 = vector.shape_cast %6 : vector<1x1x32xbf16> to vector<1x32xbf16>
    %c0_11 = arith.constant 0 : index
    %c0_12 = arith.constant 0 : index
    %8 = vector.load %arg5[%c0_11, %c0_12] : memref<32x32xbf16, #tpu.memory_space<vmem>>, vector<32x32xbf16>
    %cst = arith.constant dense<0.000000e+00> : vector<8x32xf32>
    %9 = tpu.matmul %1, %8, %cst {dimension_numbers = #tpu.dot_dimension_numbers<[1], [0], [0], [1], [0, 0, 1, 1], [], []>} : vector<8x32xbf16>, vector<32x32xbf16>, vector<8x32xf32> -> vector<8x32xf32>
    %c0_13 = arith.constant 0 : index
    %c0_14 = arith.constant 0 : index
    %10 = vector.load %arg6[%c0_13, %c0_14] : memref<1x32xf32, #tpu.memory_space<vmem>>, vector<1x32xf32>
    %11 = vector.broadcast %10 : vector<1x32xf32> to vector<8x32xf32>
    %12 = arith.addf %9, %11 : vector<8x32xf32>
    %13 = arith.truncf %12 : vector<8x32xf32> to vector<8x32xbf16>
    %c0_15 = arith.constant 0 : index
    %c0_16 = arith.constant 0 : index
    %14 = vector.load %arg7[%c0_15, %c0_16] : memref<32x32xbf16, #tpu.memory_space<vmem>>, vector<32x32xbf16>
    %cst_17 = arith.constant dense<0.000000e+00> : vector<8x32xf32>
    %15 = tpu.matmul %3, %14, %cst_17 {dimension_numbers = #tpu.dot_dimension_numbers<[1], [0], [0], [1], [0, 0, 1, 1], [], []>} : vector<8x32xbf16>, vector<32x32xbf16>, vector<8x32xf32> -> vector<8x32xf32>
    %c0_18 = arith.constant 0 : index
    %c0_19 = arith.constant 0 : index
    %16 = vector.load %arg8[%c0_18, %c0_19] : memref<1x32xf32, #tpu.memory_space<vmem>>, vector<1x32xf32>
    %17 = vector.broadcast %16 : vector<1x32xf32> to vector<8x32xf32>
    %18 = arith.addf %15, %17 : vector<8x32xf32>
    %19 = arith.truncf %18 : vector<8x32xf32> to vector<8x32xbf16>
    %c0_20 = arith.constant 0 : index
    %c0_21 = arith.constant 0 : index
    %20 = vector.load %arg11[%c0_20, %c0_21] : memref<32x32xbf16, #tpu.memory_space<vmem>>, vector<32x32xbf16>
    %cst_22 = arith.constant dense<0.000000e+00> : vector<8x32xf32>
    %21 = tpu.matmul %5, %20, %cst_22 {dimension_numbers = #tpu.dot_dimension_numbers<[1], [0], [0], [1], [0, 0, 1, 1], [], []>} : vector<8x32xbf16>, vector<32x32xbf16>, vector<8x32xf32> -> vector<8x32xf32>
    %c0_23 = arith.constant 0 : index
    %c0_24 = arith.constant 0 : index
    %22 = vector.load %arg12[%c0_23, %c0_24] : memref<1x32xf32, #tpu.memory_space<vmem>>, vector<1x32xf32>
    %23 = vector.broadcast %22 : vector<1x32xf32> to vector<8x32xf32>
    %24 = arith.addf %21, %23 : vector<8x32xf32>
    %25 = arith.truncf %24 : vector<8x32xf32> to vector<8x32xbf16>
    %c0_25 = arith.constant 0 : index
    %c0_26 = arith.constant 0 : index
    %26 = vector.load %arg9[%c0_25, %c0_26] : memref<32x64xbf16, #tpu.memory_space<vmem>>, vector<32x64xbf16>
    %cst_27 = arith.constant dense<0.000000e+00> : vector<1x64xf32>
    %27 = tpu.matmul %7, %26, %cst_27 {dimension_numbers = #tpu.dot_dimension_numbers<[1], [0], [0], [1], [0, 0, 1, 1], [], []>} : vector<1x32xbf16>, vector<32x64xbf16>, vector<1x64xf32> -> vector<1x64xf32>
    %c0_28 = arith.constant 0 : index
    %c0_29 = arith.constant 0 : index
    %28 = vector.load %arg10[%c0_28, %c0_29] : memref<1x64xf32, #tpu.memory_space<vmem>>, vector<1x64xf32>
    %29 = arith.addf %27, %28 : vector<1x64xf32>
    %30 = arith.truncf %29 : vector<1x64xf32> to vector<1x64xbf16>
    %31 = vector.shape_cast %13 : vector<8x32xbf16> to vector<1x8x32xbf16>
    %32 = vector.shape_cast %19 : vector<8x32xbf16> to vector<1x8x32xbf16>
    %33 = vector.shape_cast %25 : vector<8x32xbf16> to vector<1x8x32xbf16>
    %34 = vector.extract_strided_slice %30 {offsets = [0, 0], sizes = [1, 32], strides = [1, 1]} : vector<1x64xbf16> to vector<1x32xbf16>
    %35 = vector.shape_cast %34 : vector<1x32xbf16> to vector<1x1x32xbf16>
    %36 = vector.extract_strided_slice %30 {offsets = [0, 32], sizes = [1, 32], strides = [1, 1]} : vector<1x64xbf16> to vector<1x32xbf16>
    %37 = vector.shape_cast %36 : vector<1x32xbf16> to vector<1x1x32xbf16>
    %38 = vector.extract_strided_slice %31 {offsets = [0, 0, 0], sizes = [1, 8, 16], strides = [1, 1, 1]} : vector<1x8x32xbf16> to vector<1x8x16xbf16>
    %39 = vector.extract_strided_slice %32 {offsets = [0, 0, 0], sizes = [1, 8, 16], strides = [1, 1, 1]} : vector<1x8x32xbf16> to vector<1x8x16xbf16>
    %40 = vector.extract_strided_slice %35 {offsets = [0, 0, 0], sizes = [1, 1, 16], strides = [1, 1, 1]} : vector<1x1x32xbf16> to vector<1x1x16xbf16>
    %41 = vector.extract_strided_slice %33 {offsets = [0, 0, 0], sizes = [1, 8, 16], strides = [1, 1, 1]} : vector<1x8x32xbf16> to vector<1x8x16xbf16>
    %42 = vector.extract_strided_slice %37 {offsets = [0, 0, 0], sizes = [1, 1, 16], strides = [1, 1, 1]} : vector<1x1x32xbf16> to vector<1x1x16xbf16>
    "tpu.trace_start"() <{level = 10 : i32, message = "bqd,bkd->bqk"}> : () -> ()
    %cst_30 = arith.constant dense<0.000000e+00> : vector<1x8x8xf32>
    %43 = tpu.matmul %38, %39, %cst_30 {dimension_numbers = #tpu.dot_dimension_numbers<[2], [2], [1], [1], [0, 0, 0, 1, 1, 1], [0], [0]>} : vector<1x8x16xbf16>, vector<1x8x16xbf16>, vector<1x8x8xf32> -> vector<1x8x8xf32>
    "tpu.trace_stop"() : () -> ()
    "tpu.trace_start"() <{level = 10 : i32, message = "bqd,bgd->bqg"}> : () -> ()
    %cst_31 = arith.constant dense<0.000000e+00> : vector<1x8x1xf32>
    %44 = tpu.matmul %38, %40, %cst_31 {dimension_numbers = #tpu.dot_dimension_numbers<[2], [2], [1], [1], [0, 0, 0, 1, 1, 1], [0], [0]>} : vector<1x8x16xbf16>, vector<1x1x16xbf16>, vector<1x8x1xf32> -> vector<1x8x1xf32>
    "tpu.trace_stop"() : () -> ()
    %cst_32 = arith.constant dense<0xFF800000> : vector<1x8xf32>
    %45 = vector.multi_reduction <maximumf>, %43, %cst_32 [2] : vector<1x8x8xf32> to vector<1x8xf32>
    %46 = vector.shape_cast %45 : vector<1x8xf32> to vector<1x8x1xf32>
    %cst_33 = arith.constant dense<0xFF800000> : vector<1x8xf32>
    %47 = vector.multi_reduction <maximumf>, %44, %cst_33 [2] : vector<1x8x1xf32> to vector<1x8xf32>
    %48 = vector.shape_cast %47 : vector<1x8xf32> to vector<1x8x1xf32>
    %49 = arith.maximumf %46, %48 : vector<1x8x1xf32>
    %50 = vector.broadcast %49 : vector<1x8x1xf32> to vector<1x8x8xf32>
    %51 = arith.subf %43, %50 : vector<1x8x8xf32>
    %52 = math.exp %51 : vector<1x8x8xf32>
    %53 = arith.subf %44, %49 : vector<1x8x1xf32>
    %54 = math.exp %53 : vector<1x8x1xf32>
    %cst_34 = arith.constant dense<0.000000e+00> : vector<1x8xf32>
    %55 = vector.multi_reduction <add>, %52, %cst_34 [2] : vector<1x8x8xf32> to vector<1x8xf32>
    %56 = vector.shape_cast %55 : vector<1x8xf32> to vector<1x8x1xf32>
    %cst_35 = arith.constant dense<0.000000e+00> : vector<1x8xf32>
    %57 = vector.multi_reduction <add>, %54, %cst_35 [2] : vector<1x8x1xf32> to vector<1x8xf32>
    %58 = vector.shape_cast %57 : vector<1x8xf32> to vector<1x8x1xf32>
    %59 = arith.addf %56, %58 : vector<1x8x1xf32>
    %60 = tpu.reciprocal %59 {approx = true} : vector<1x8x1xf32> -> vector<1x8x1xf32>
    %61 = arith.mulf %59, %60 : vector<1x8x1xf32>
    %cst_36 = arith.constant 2.000000e+00 : f32
    %62 = vector.broadcast %cst_36 : f32 to vector<1x8x1xf32>
    %63 = arith.subf %62, %61 : vector<1x8x1xf32>
    %64 = arith.mulf %60, %63 : vector<1x8x1xf32>
    %65 = vector.broadcast %64 : vector<1x8x1xf32> to vector<1x8x8xf32>
    %66 = arith.mulf %52, %65 : vector<1x8x8xf32>
    %67 = arith.truncf %66 : vector<1x8x8xf32> to vector<1x8x8xbf16>
    %68 = arith.mulf %54, %64 : vector<1x8x1xf32>
    %69 = arith.truncf %68 : vector<1x8x1xf32> to vector<1x8x1xbf16>
    "tpu.trace_start"() <{level = 10 : i32, message = "bqk,bkd->bqd"}> : () -> ()
    %cst_37 = arith.constant dense<0.000000e+00> : vector<1x8x16xf32>
    %70 = tpu.matmul %67, %41, %cst_37 {dimension_numbers = #tpu.dot_dimension_numbers<[2], [1], [1], [2], [0, 0, 0, 1, 1, 2], [0], [0]>} : vector<1x8x8xbf16>, vector<1x8x16xbf16>, vector<1x8x16xf32> -> vector<1x8x16xf32>
    "tpu.trace_stop"() : () -> ()
    "tpu.trace_start"() <{level = 10 : i32, message = "bqg,bgd->bqd"}> : () -> ()
    %cst_38 = arith.constant dense<0.000000e+00> : vector<1x8x16xf32>
    %71 = tpu.matmul %69, %42, %cst_38 {dimension_numbers = #tpu.dot_dimension_numbers<[2], [1], [1], [2], [0, 0, 0, 1, 1, 2], [0], [0]>} : vector<1x8x1xbf16>, vector<1x1x16xbf16>, vector<1x8x16xf32> -> vector<1x8x16xf32>
    "tpu.trace_stop"() : () -> ()
    %72 = arith.addf %70, %71 : vector<1x8x16xf32>
    %73 = vector.shape_cast %72 : vector<1x8x16xf32> to vector<8x16xf32>
    %74 = arith.truncf %73 : vector<8x16xf32> to vector<8x16xbf16>
    %c0_39 = arith.constant 0 : index
    %c0_40 = arith.constant 0 : index
    %75 = vector.load %arg16[%c0_39, %c0_40] : memref<8x32xbf16, #tpu.memory_space<vmem>>, vector<8x16xbf16>
    tpu.vector_store %arg16[%c0_39, %c0_40], %74 {strides = array<i32>} : memref<8x32xbf16, #tpu.memory_space<vmem>>, vector<8x16xbf16>,
    %76 = vector.extract_strided_slice %31 {offsets = [0, 0, 16], sizes = [1, 8, 16], strides = [1, 1, 1]} : vector<1x8x32xbf16> to vector<1x8x16xbf16>
    %77 = vector.extract_strided_slice %32 {offsets = [0, 0, 16], sizes = [1, 8, 16], strides = [1, 1, 1]} : vector<1x8x32xbf16> to vector<1x8x16xbf16>
    %78 = vector.extract_strided_slice %35 {offsets = [0, 0, 16], sizes = [1, 1, 16], strides = [1, 1, 1]} : vector<1x1x32xbf16> to vector<1x1x16xbf16>
    %79 = vector.extract_strided_slice %33 {offsets = [0, 0, 16], sizes = [1, 8, 16], strides = [1, 1, 1]} : vector<1x8x32xbf16> to vector<1x8x16xbf16>
    %80 = vector.extract_strided_slice %37 {offsets = [0, 0, 16], sizes = [1, 1, 16], strides = [1, 1, 1]} : vector<1x1x32xbf16> to vector<1x1x16xbf16>
    "tpu.trace_start"() <{level = 10 : i32, message = "bqd,bkd->bqk"}> : () -> ()
    %cst_41 = arith.constant dense<0.000000e+00> : vector<1x8x8xf32>
    %81 = tpu.matmul %76, %77, %cst_41 {dimension_numbers = #tpu.dot_dimension_numbers<[2], [2], [1], [1], [0, 0, 0, 1, 1, 1], [0], [0]>} : vector<1x8x16xbf16>, vector<1x8x16xbf16>, vector<1x8x8xf32> -> vector<1x8x8xf32>
    "tpu.trace_stop"() : () -> ()
    "tpu.trace_start"() <{level = 10 : i32, message = "bqd,bgd->bqg"}> : () -> ()
    %cst_42 = arith.constant dense<0.000000e+00> : vector<1x8x1xf32>
    %82 = tpu.matmul %76, %78, %cst_42 {dimension_numbers = #tpu.dot_dimension_numbers<[2], [2], [1], [1], [0, 0, 0, 1, 1, 1], [0], [0]>} : vector<1x8x16xbf16>, vector<1x1x16xbf16>, vector<1x8x1xf32> -> vector<1x8x1xf32>
    "tpu.trace_stop"() : () -> ()
    %cst_43 = arith.constant dense<0xFF800000> : vector<1x8xf32>
    %83 = vector.multi_reduction <maximumf>, %81, %cst_43 [2] : vector<1x8x8xf32> to vector<1x8xf32>
    %84 = vector.shape_cast %83 : vector<1x8xf32> to vector<1x8x1xf32>
    %cst_44 = arith.constant dense<0xFF800000> : vector<1x8xf32>
    %85 = vector.multi_reduction <maximumf>, %82, %cst_44 [2] : vector<1x8x1xf32> to vector<1x8xf32>
    %86 = vector.shape_cast %85 : vector<1x8xf32> to vector<1x8x1xf32>
    %87 = arith.maximumf %84, %86 : vector<1x8x1xf32>
    %88 = vector.broadcast %87 : vector<1x8x1xf32> to vector<1x8x8xf32>
    %89 = arith.subf %81, %88 : vector<1x8x8xf32>
    %90 = math.exp %89 : vector<1x8x8xf32>
    %91 = arith.subf %82, %87 : vector<1x8x1xf32>
    %92 = math.exp %91 : vector<1x8x1xf32>
    %cst_45 = arith.constant dense<0.000000e+00> : vector<1x8xf32>
    %93 = vector.multi_reduction <add>, %90, %cst_45 [2] : vector<1x8x8xf32> to vector<1x8xf32>
    %94 = vector.shape_cast %93 : vector<1x8xf32> to vector<1x8x1xf32>
    %cst_46 = arith.constant dense<0.000000e+00> : vector<1x8xf32>
    %95 = vector.multi_reduction <add>, %92, %cst_46 [2] : vector<1x8x1xf32> to vector<1x8xf32>
    %96 = vector.shape_cast %95 : vector<1x8xf32> to vector<1x8x1xf32>
    %97 = arith.addf %94, %96 : vector<1x8x1xf32>
    %98 = tpu.reciprocal %97 {approx = true} : vector<1x8x1xf32> -> vector<1x8x1xf32>
    %99 = arith.mulf %97, %98 : vector<1x8x1xf32>
    %cst_47 = arith.constant 2.000000e+00 : f32
    %100 = vector.broadcast %cst_47 : f32 to vector<1x8x1xf32>
    %101 = arith.subf %100, %99 : vector<1x8x1xf32>
    %102 = arith.mulf %98, %101 : vector<1x8x1xf32>
    %103 = vector.broadcast %102 : vector<1x8x1xf32> to vector<1x8x8xf32>
    %104 = arith.mulf %90, %103 : vector<1x8x8xf32>
    %105 = arith.truncf %104 : vector<1x8x8xf32> to vector<1x8x8xbf16>
    %106 = arith.mulf %92, %102 : vector<1x8x1xf32>
    %107 = arith.truncf %106 : vector<1x8x1xf32> to vector<1x8x1xbf16>
    "tpu.trace_start"() <{level = 10 : i32, message = "bqk,bkd->bqd"}> : () -> ()
    %cst_48 = arith.constant dense<0.000000e+00> : vector<1x8x16xf32>
    %108 = tpu.matmul %105, %79, %cst_48 {dimension_numbers = #tpu.dot_dimension_numbers<[2], [1], [1], [2], [0, 0, 0, 1, 1, 2], [0], [0]>} : vector<1x8x8xbf16>, vector<1x8x16xbf16>, vector<1x8x16xf32> -> vector<1x8x16xf32>
    "tpu.trace_stop"() : () -> ()
    "tpu.trace_start"() <{level = 10 : i32, message = "bqg,bgd->bqd"}> : () -> ()
    %cst_49 = arith.constant dense<0.000000e+00> : vector<1x8x16xf32>
    %109 = tpu.matmul %107, %80, %cst_49 {dimension_numbers = #tpu.dot_dimension_numbers<[2], [1], [1], [2], [0, 0, 0, 1, 1, 2], [0], [0]>} : vector<1x8x1xbf16>, vector<1x1x16xbf16>, vector<1x8x16xf32> -> vector<1x8x16xf32>
    "tpu.trace_stop"() : () -> ()
    %110 = arith.addf %108, %109 : vector<1x8x16xf32>
    %111 = vector.shape_cast %110 : vector<1x8x16xf32> to vector<8x16xf32>
    %112 = arith.truncf %111 : vector<8x16xf32> to vector<8x16xbf16>
    %c0_50 = arith.constant 0 : index
    %c16 = arith.constant 16 : index
    %113 = vector.load %arg16[%c0_50, %c16] : memref<8x32xbf16, #tpu.memory_space<vmem>>, vector<8x16xbf16>
    tpu.vector_store %arg16[%c0_50, %c16], %112 {strides = array<i32>} : memref<8x32xbf16, #tpu.memory_space<vmem>>, vector<8x16xbf16>,
    %c0_51 = arith.constant 0 : index
    %c0_52 = arith.constant 0 : index
    %114 = vector.load %arg16[%c0_51, %c0_52] : memref<8x32xbf16, #tpu.memory_space<vmem>>, vector<8x32xbf16>
    %c0_53 = arith.constant 0 : index
    %c0_54 = arith.constant 0 : index
    %115 = vector.load %arg13[%c0_53, %c0_54] : memref<32x128xbf16, #tpu.memory_space<vmem>>, vector<32x128xbf16>
    %cst_55 = arith.constant dense<0.000000e+00> : vector<8x128xf32>
    %116 = tpu.matmul %114, %115, %cst_55 {dimension_numbers = #tpu.dot_dimension_numbers<[1], [0], [0], [1], [0, 0, 1, 1], [], []>} : vector<8x32xbf16>, vector<32x128xbf16>, vector<8x128xf32> -> vector<8x128xf32>
    %c0_56 = arith.constant 0 : index
    %c0_57 = arith.constant 0 : index
    %117 = vector.load %arg14[%c0_56, %c0_57] : memref<1x128xf32, #tpu.memory_space<vmem>>, vector<1x128xf32>
    %118 = vector.broadcast %117 : vector<1x128xf32> to vector<8x128xf32>
    %119 = arith.addf %116, %118 : vector<8x128xf32>
    %120 = vector.shape_cast %119 : vector<8x128xf32> to vector<1x8x128xf32>
    %c0_58 = arith.constant 0 : index
    %c0_59 = arith.constant 0 : index
    %c0_60 = arith.constant 0 : index
    %121 = vector.load %arg15[%c0_58, %c0_59, %c0_60] : memref<1x8x128xf32, #tpu.memory_space<vmem>>, vector<1x8x128xf32>
    tpu.vector_store %arg15[%c0_58, %c0_59, %c0_60], %120 {strides = array<i32>} : memref<1x8x128xf32, #tpu.memory_space<vmem>>, vector<1x8x128xf32>,
    return
  }
  func.func @transform_0(%arg0: i32) -> (i32, i32, i32) {
    %c0_i32 = arith.constant 0 : i32
    %c0_i32_0 = arith.constant 0 : i32
    %c0_i32_1 = arith.constant 0 : i32
    return %arg0, %c0_i32, %c0_i32_0 : i32, i32, i32
  }
  func.func @transform_1(%arg0: i32) -> (i32, i32, i32) {
    %c0_i32 = arith.constant 0 : i32
    %c0_i32_0 = arith.constant 0 : i32
    %c0_i32_1 = arith.constant 0 : i32
    return %arg0, %c0_i32, %c0_i32_0 : i32, i32, i32
  }
  func.func @transform_2(%arg0: i32) -> (i32, i32, i32) {
    %c0_i32 = arith.constant 0 : i32
    %c0_i32_0 = arith.constant 0 : i32
    %c0_i32_1 = arith.constant 0 : i32
    return %arg0, %c0_i32, %c0_i32_0 : i32, i32, i32
  }
  func.func @transform_3(%arg0: i32) -> (i32, i32, i32) {
    %c0_i32 = arith.constant 0 : i32
    %c0_i32_0 = arith.constant 0 : i32
    %c0_i32_1 = arith.constant 0 : i32
    return %arg0, %c0_i32, %c0_i32_0 : i32, i32, i32
  }
  func.func @transform_4(%arg0: i32) -> (i32, i32) {
    %c0_i32 = arith.constant 0 : i32
    %c0_i32_0 = arith.constant 0 : i32
    %c0_i32_1 = arith.constant 0 : i32
    return %c0_i32, %c0_i32_0 : i32, i32
  }
  func.func @transform_5(%arg0: i32) -> (i32, i32) {
    %c0_i32 = arith.constant 0 : i32
    %c0_i32_0 = arith.constant 0 : i32
    %c0_i32_1 = arith.constant 0 : i32
    return %c0_i32, %c0_i32_0 : i32, i32
  }
  func.func @transform_6(%arg0: i32) -> (i32, i32) {
    %c0_i32 = arith.constant 0 : i32
    %c0_i32_0 = arith.constant 0 : i32
    %c0_i32_1 = arith.constant 0 : i32
    return %c0_i32, %c0_i32_0 : i32, i32
  }
  func.func @transform_7(%arg0: i32) -> (i32, i32) {
    %c0_i32 = arith.constant 0 : i32
    %c0_i32_0 = arith.constant 0 : i32
    %c0_i32_1 = arith.constant 0 : i32
    return %c0_i32, %c0_i32_0 : i32, i32
  }
  func.func @transform_8(%arg0: i32) -> (i32, i32) {
    %c0_i32 = arith.constant 0 : i32
    %c0_i32_0 = arith.constant 0 : i32
    %c0_i32_1 = arith.constant 0 : i32
    return %c0_i32, %c0_i32_0 : i32, i32
  }
  func.func @transform_9(%arg0: i32) -> (i32, i32) {
    %c0_i32 = arith.constant 0 : i32
    %c0_i32_0 = arith.constant 0 : i32
    %c0_i32_1 = arith.constant 0 : i32
    return %c0_i32, %c0_i32_0 : i32, i32
  }
  func.func @transform_10(%arg0: i32) -> (i32, i32) {
    %c0_i32 = arith.constant 0 : i32
    %c0_i32_0 = arith.constant 0 : i32
    %c0_i32_1 = arith.constant 0 : i32
    return %c0_i32, %c0_i32_0 : i32, i32
  }
  func.func @transform_11(%arg0: i32) -> (i32, i32) {
    %c0_i32 = arith.constant 0 : i32
    %c0_i32_0 = arith.constant 0 : i32
    %c0_i32_1 = arith.constant 0 : i32
    return %c0_i32, %c0_i32_0 : i32, i32
  }
  func.func @transform_12(%arg0: i32) -> (i32, i32) {
    %c0_i32 = arith.constant 0 : i32
    %c0_i32_0 = arith.constant 0 : i32
    %c0_i32_1 = arith.constant 0 : i32
    return %c0_i32, %c0_i32_0 : i32, i32
  }
  func.func @transform_13(%arg0: i32) -> (i32, i32) {
    %c0_i32 = arith.constant 0 : i32
    %c0_i32_0 = arith.constant 0 : i32
    %c0_i32_1 = arith.constant 0 : i32
    return %c0_i32, %c0_i32_0 : i32, i32
  }
  func.func @transform_14(%arg0: i32) -> (i32, i32, i32) {
    %c0_i32 = arith.constant 0 : i32
    %c0_i32_0 = arith.constant 0 : i32
    %c0_i32_1 = arith.constant 0 : i32
    return %arg0, %c0_i32, %c0_i32_0 : i32, i32, i32
  }
}

module attributes {stable_mosaic.version = 11 : i64} {
  func.func @_attn_mem_kernel(%arg0: i32, %arg1: memref<1x8x32xbf16, #tpu.memory_space<vmem>>, %arg2: memref<1x8x32xbf16, #tpu.memory_space<vmem>>, %arg3: memref<1x8x32xbf16, #tpu.memory_space<vmem>>, %arg4: memref<1x1x32xbf16, #tpu.memory_space<vmem>>, %arg5: memref<32x32xbf16, #tpu.memory_space<vmem>>, %arg6: memref<1x32xf32, #tpu.memory_space<vmem>>, %arg7: memref<32x32xbf16, #tpu.memory_space<vmem>>, %arg8: memref<1x32xf32, #tpu.memory_space<vmem>>, %arg9: memref<32x64xbf16, #tpu.memory_space<vmem>>, %arg10: memref<1x64xf32, #tpu.memory_space<vmem>>, %arg11: memref<32x32xbf16, #tpu.memory_space<vmem>>, %arg12: memref<1x32xf32, #tpu.memory_space<vmem>>, %arg13: memref<32x128xbf16, #tpu.memory_space<vmem>>, %arg14: memref<1x128xf32, #tpu.memory_space<vmem>>, %arg15: memref<1x8x128xf32, #tpu.memory_space<vmem>>, %arg16: memref<8x32xbf16, #tpu.memory_space<vmem>>) attributes {dimension_semantics = [#tpu.dimension_semantics<parallel>], iteration_bounds = array<i64: 2>, scalar_prefetch = 0 : i64, scratch_operands = 1 : i64, tpu.core_type = #tpu.core_type<tc>, window_params = [{transform_indices = @transform_0, window_bounds = array<i64: 1, 8, 32>}, {transform_indices = @transform_1, window_bounds = array<i64: 1, 8, 32>}, {transform_indices = @transform_2, window_bounds = array<i64: 1, 8, 32>}, {transform_indices = @transform_3, window_bounds = array<i64: 1, 1, 32>}, {pipeline_mode = #tpu.pipeline_mode<synchronous>, transform_indices = @transform_4, window_bounds = array<i64: 32, 32>}, {pipeline_mode = #tpu.pipeline_mode<synchronous>, transform_indices = @transform_5, window_bounds = array<i64: 1, 32>}, {pipeline_mode = #tpu.pipeline_mode<synchronous>, transform_indices = @transform_6, window_bounds = array<i64: 32, 32>}, {pipeline_mode = #tpu.pipeline_mode<synchronous>, transform_indices = @transform_7, window_bounds = array<i64: 1, 32>}, {pipeline_mode = #tpu.pipeline_mode<synchronous>, transform_indices = @transform_8, window_bounds = array<i64: 32, 64>}, {pipeline_mode = #tpu.pipeline_mode<synchronous>, transform_indices = @transform_9, window_bounds = array<i64: 1, 64>}, {pipeline_mode = #tpu.pipeline_mode<synchronous>, transform_indices = @transform_10, window_bounds = array<i64: 32, 32>}, {pipeline_mode = #tpu.pipeline_mode<synchronous>, transform_indices = @transform_11, window_bounds = array<i64: 1, 32>}, {pipeline_mode = #tpu.pipeline_mode<synchronous>, transform_indices = @transform_12, window_bounds = array<i64: 32, 128>}, {pipeline_mode = #tpu.pipeline_mode<synchronous>, transform_indices = @transform_13, window_bounds = array<i64: 1, 128>}, {transform_indices = @transform_14, window_bounds = array<i64: 1, 8, 128>}]} {
    %c0 = arith.constant 0 : index
    %c0_0 = arith.constant 0 : index
    %c0_1 = arith.constant 0 : index
    %0 = vector.load %arg1[%c0, %c0_0, %c0_1] : memref<1x8x32xbf16, #tpu.memory_space<vmem>>, vector<1x8x32xbf16>
    %1 = vector.shape_cast %0 : vector<1x8x32xbf16> to vector<8x32xbf16>
    %c0_2 = arith.constant 0 : index
    %c0_3 = arith.constant 0 : index
    %c0_4 = arith.constant 0 : index
    %2 = vector.load %arg2[%c0_2, %c0_3, %c0_4] : memref<1x8x32xbf16, #tpu.memory_space<vmem>>, vector<1x8x32xbf16>
    %3 = vector.shape_cast %2 : vector<1x8x32xbf16> to vector<8x32xbf16>
    %c0_5 = arith.constant 0 : index
    %c0_6 = arith.constant 0 : index
    %c0_7 = arith.constant 0 : index
    %4 = vector.load %arg3[%c0_5, %c0_6, %c0_7] : memref<1x8x32xbf16, #tpu.memory_space<vmem>>, vector<1x8x32xbf16>
    %5 = vector.shape_cast %4 : vector<1x8x32xbf16> to vector<8x32xbf16>
    %c0_8 = arith.constant 0 : index
    %c0_9 = arith.constant 0 : index
    %c0_10 = arith.constant 0 : index
    %6 = vector.load %arg4[%c0_8, %c0_9, %c0_10] : memref<1x1x32xbf16, #tpu.memory_space<vmem>>, vector<1x1x32xbf16>
    %7 = vector.shape_cast %6 : vector<1x1x32xbf16> to vector<1x32xbf16>
    %c0_11 = arith.constant 0 : index
    %c0_12 = arith.constant 0 : index
    %8 = vector.load %arg5[%c0_11, %c0_12] : memref<32x32xbf16, #tpu.memory_space<vmem>>, vector<32x32xbf16>
    %cst = arith.constant dense<0.000000e+00> : vector<8x32xf32>
    %9 = tpu.matmul %1, %8, %cst {dimension_numbers = #tpu.dot_dimension_numbers<[1], [0], [0], [1], [0, 0, 1, 1], [], []>} : vector<8x32xbf16>, vector<32x32xbf16>, vector<8x32xf32> -> vector<8x32xf32>
    %c0_13 = arith.constant 0 : index
    %c0_14 = arith.constant 0 : index
    %10 = vector.load %arg6[%c0_13, %c0_14] : memref<1x32xf32, #tpu.memory_space<vmem>>, vector<1x32xf32>
    %11 = vector.broadcast %10 : vector<1x32xf32> to vector<8x32xf32>
    %12 = arith.addf %9, %11 : vector<8x32xf32>
    %13 = arith.truncf %12 : vector<8x32xf32> to vector<8x32xbf16>
    %c0_15 = arith.constant 0 : index
    %c0_16 = arith.constant 0 : index
    %14 = vector.load %arg7[%c0_15, %c0_16] : memref<32x32xbf16, #tpu.memory_space<vmem>>, vector<32x32xbf16>
    %cst_17 = arith.constant dense<0.000000e+00> : vector<8x32xf32>
    %15 = tpu.matmul %3, %14, %cst_17 {dimension_numbers = #tpu.dot_dimension_numbers<[1], [0], [0], [1], [0, 0, 1, 1], [], []>} : vector<8x32xbf16>, vector<32x32xbf16>, vector<8x32xf32> -> vector<8x32xf32>
    %c0_18 = arith.constant 0 : index
    %c0_19 = arith.constant 0 : index
    %16 = vector.load %arg8[%c0_18, %c0_19] : memref<1x32xf32, #tpu.memory_space<vmem>>, vector<1x32xf32>
    %17 = vector.broadcast %16 : vector<1x32xf32> to vector<8x32xf32>
    %18 = arith.addf %15, %17 : vector<8x32xf32>
    %19 = arith.truncf %18 : vector<8x32xf32> to vector<8x32xbf16>
    %c0_20 = arith.constant 0 : index
    %c0_21 = arith.constant 0 : index
    %20 = vector.load %arg11[%c0_20, %c0_21] : memref<32x32xbf16, #tpu.memory_space<vmem>>, vector<32x32xbf16>
    %cst_22 = arith.constant dense<0.000000e+00> : vector<8x32xf32>
    %21 = tpu.matmul %5, %20, %cst_22 {dimension_numbers = #tpu.dot_dimension_numbers<[1], [0], [0], [1], [0, 0, 1, 1], [], []>} : vector<8x32xbf16>, vector<32x32xbf16>, vector<8x32xf32> -> vector<8x32xf32>
    %c0_23 = arith.constant 0 : index
    %c0_24 = arith.constant 0 : index
    %22 = vector.load %arg12[%c0_23, %c0_24] : memref<1x32xf32, #tpu.memory_space<vmem>>, vector<1x32xf32>
    %23 = vector.broadcast %22 : vector<1x32xf32> to vector<8x32xf32>
    %24 = arith.addf %21, %23 : vector<8x32xf32>
    %25 = arith.truncf %24 : vector<8x32xf32> to vector<8x32xbf16>
    %c0_25 = arith.constant 0 : index
    %c0_26 = arith.constant 0 : index
    %26 = vector.load %arg9[%c0_25, %c0_26] : memref<32x64xbf16, #tpu.memory_space<vmem>>, vector<32x64xbf16>
    %cst_27 = arith.constant dense<0.000000e+00> : vector<1x64xf32>
    %27 = tpu.matmul %7, %26, %cst_27 {dimension_numbers = #tpu.dot_dimension_numbers<[1], [0], [0], [1], [0, 0, 1, 1], [], []>} : vector<1x32xbf16>, vector<32x64xbf16>, vector<1x64xf32> -> vector<1x64xf32>
    %c0_28 = arith.constant 0 : index
    %c0_29 = arith.constant 0 : index
    %28 = vector.load %arg10[%c0_28, %c0_29] : memref<1x64xf32, #tpu.memory_space<vmem>>, vector<1x64xf32>
    %29 = arith.addf %27, %28 : vector<1x64xf32>
    %30 = arith.truncf %29 : vector<1x64xf32> to vector<1x64xbf16>
    %31 = vector.shape_cast %13 : vector<8x32xbf16> to vector<1x8x32xbf16>
    %32 = vector.shape_cast %19 : vector<8x32xbf16> to vector<1x8x32xbf16>
    %33 = vector.shape_cast %25 : vector<8x32xbf16> to vector<1x8x32xbf16>
    %34 = vector.extract_strided_slice %30 {offsets = [0, 0], sizes = [1, 32], strides = [1, 1]} : vector<1x64xbf16> to vector<1x32xbf16>
    %35 = vector.shape_cast %34 : vector<1x32xbf16> to vector<1x1x32xbf16>
    %36 = vector.extract_strided_slice %30 {offsets = [0, 32], sizes = [1, 32], strides = [1, 1]} : vector<1x64xbf16> to vector<1x32xbf16>
    %37 = vector.shape_cast %36 : vector<1x32xbf16> to vector<1x1x32xbf16>
    %38 = vector.extract_strided_slice %31 {offsets = [0, 0, 0], sizes = [1, 8, 16], strides = [1, 1, 1]} : vector<1x8x32xbf16> to vector<1x8x16xbf16>
    %39 = vector.extract_strided_slice %32 {offsets = [0, 0, 0], sizes = [1, 8, 16], strides = [1, 1, 1]} : vector<1x8x32xbf16> to vector<1x8x16xbf16>
    %40 = vector.extract_strided_slice %35 {offsets = [0, 0, 0], sizes = [1, 1, 16], strides = [1, 1, 1]} : vector<1x1x32xbf16> to vector<1x1x16xbf16>
    %41 = vector.extract_strided_slice %33 {offsets = [0, 0, 0], sizes = [1, 8, 16], strides = [1, 1, 1]} : vector<1x8x32xbf16> to vector<1x8x16xbf16>
    %42 = vector.extract_strided_slice %37 {offsets = [0, 0, 0], sizes = [1, 1, 16], strides = [1, 1, 1]} : vector<1x1x32xbf16> to vector<1x1x16xbf16>
    "tpu.trace_start"() <{level = 10 : i32, message = "bqd,bkd->bqk"}> : () -> ()
    %cst_30 = arith.constant dense<0.000000e+00> : vector<1x8x8xf32>
    %43 = tpu.matmul %38, %39, %cst_30 {dimension_numbers = #tpu.dot_dimension_numbers<[2], [2], [1], [1], [0, 0, 0, 1, 1, 1], [0], [0]>} : vector<1x8x16xbf16>, vector<1x8x16xbf16>, vector<1x8x8xf32> -> vector<1x8x8xf32>
    "tpu.trace_stop"() : () -> ()
    "tpu.trace_start"() <{level = 10 : i32, message = "bqd,bgd->bqg"}> : () -> ()
    %cst_31 = arith.constant dense<0.000000e+00> : vector<1x8x1xf32>
    %44 = tpu.matmul %38, %40, %cst_31 {dimension_numbers = #tpu.dot_dimension_numbers<[2], [2], [1], [1], [0, 0, 0, 1, 1, 1], [0], [0]>} : vector<1x8x16xbf16>, vector<1x1x16xbf16>, vector<1x8x1xf32> -> vector<1x8x1xf32>
    "tpu.trace_stop"() : () -> ()
    %cst_32 = arith.constant dense<0xFF800000> : vector<1x8xf32>
    %45 = vector.multi_reduction <maximumf>, %43, %cst_32 [2] : vector<1x8x8xf32> to vector<1x8xf32>
    %46 = vector.shape_cast %45 : vector<1x8xf32> to vector<1x8x1xf32>
    %cst_33 = arith.constant dense<0xFF800000> : vector<1x8xf32>
    %47 = vector.multi_reduction <maximumf>, %44, %cst_33 [2] : vector<1x8x1xf32> to vector<1x8xf32>
    %48 = vector.shape_cast %47 : vector<1x8xf32> to vector<1x8x1xf32>
    %49 = arith.maximumf %46, %48 : vector<1x8x1xf32>
    %50 = vector.broadcast %49 : vector<1x8x1xf32> to vector<1x8x8xf32>
    %51 = arith.subf %43, %50 : vector<1x8x8xf32>
    %52 = math.exp %51 : vector<1x8x8xf32>
    %53 = arith.subf %44, %49 : vector<1x8x1xf32>
    %54 = math.exp %53 : vector<1x8x1xf32>
    %cst_34 = arith.constant dense<0.000000e+00> : vector<1x8xf32>
    %55 = vector.multi_reduction <add>, %52, %cst_34 [2] : vector<1x8x8xf32> to vector<1x8xf32>
    %56 = vector.shape_cast %55 : vector<1x8xf32> to vector<1x8x1xf32>
    %cst_35 = arith.constant dense<0.000000e+00> : vector<1x8xf32>
    %57 = vector.multi_reduction <add>, %54, %cst_35 [2] : vector<1x8x1xf32> to vector<1x8xf32>
    %58 = vector.shape_cast %57 : vector<1x8xf32> to vector<1x8x1xf32>
    %59 = arith.addf %56, %58 : vector<1x8x1xf32>
    %60 = tpu.reciprocal %59 {approx = true} : vector<1x8x1xf32> -> vector<1x8x1xf32>
    %61 = arith.mulf %59, %60 : vector<1x8x1xf32>
    %cst_36 = arith.constant 2.000000e+00 : f32
    %62 = vector.broadcast %cst_36 : f32 to vector<1x8x1xf32>
    %63 = arith.subf %62, %61 : vector<1x8x1xf32>
    %64 = arith.mulf %60, %63 : vector<1x8x1xf32>
    %65 = vector.broadcast %64 : vector<1x8x1xf32> to vector<1x8x8xf32>
    %66 = arith.mulf %52, %65 : vector<1x8x8xf32>
    %67 = arith.truncf %66 : vector<1x8x8xf32> to vector<1x8x8xbf16>
    %68 = arith.mulf %54, %64 : vector<1x8x1xf32>
    %69 = arith.truncf %68 : vector<1x8x1xf32> to vector<1x8x1xbf16>
    "tpu.trace_start"() <{level = 10 : i32, message = "bqk,bkd->bqd"}> : () -> ()
    %cst_37 = arith.constant dense<0.000000e+00> : vector<1x8x16xf32>
    %70 = tpu.matmul %67, %41, %cst_37 {dimension_numbers = #tpu.dot_dimension_numbers<[2], [1], [1], [2], [0, 0, 0, 1, 1, 2], [0], [0]>} : vector<1x8x8xbf16>, vector<1x8x16xbf16>, vector<1x8x16xf32> -> vector<1x8x16xf32>
    "tpu.trace_stop"() : () -> ()
    "tpu.trace_start"() <{level = 10 : i32, message = "bqg,bgd->bqd"}> : () -> ()
    %cst_38 = arith.constant dense<0.000000e+00> : vector<1x8x16xf32>
    %71 = tpu.matmul %69, %42, %cst_38 {dimension_numbers = #tpu.dot_dimension_numbers<[2], [1], [1], [2], [0, 0, 0, 1, 1, 2], [0], [0]>} : vector<1x8x1xbf16>, vector<1x1x16xbf16>, vector<1x8x16xf32> -> vector<1x8x16xf32>
    "tpu.trace_stop"() : () -> ()
    %72 = arith.addf %70, %71 : vector<1x8x16xf32>
    %73 = vector.shape_cast %72 : vector<1x8x16xf32> to vector<8x16xf32>
    %74 = arith.truncf %73 : vector<8x16xf32> to vector<8x16xbf16>
    %c0_39 = arith.constant 0 : index
    %c0_40 = arith.constant 0 : index
    %75 = vector.load %arg16[%c0_39, %c0_40] : memref<8x32xbf16, #tpu.memory_space<vmem>>, vector<8x16xbf16>
    tpu.vector_store %arg16[%c0_39, %c0_40], %74 {strides = array<i32>} : memref<8x32xbf16, #tpu.memory_space<vmem>>, vector<8x16xbf16>,
    %76 = vector.extract_strided_slice %31 {offsets = [0, 0, 16], sizes = [1, 8, 16], strides = [1, 1, 1]} : vector<1x8x32xbf16> to vector<1x8x16xbf16>
    %77 = vector.extract_strided_slice %32 {offsets = [0, 0, 16], sizes = [1, 8, 16], strides = [1, 1, 1]} : vector<1x8x32xbf16> to vector<1x8x16xbf16>
    %78 = vector.extract_strided_slice %35 {offsets = [0, 0, 16], sizes = [1, 1, 16], strides = [1, 1, 1]} : vector<1x1x32xbf16> to vector<1x1x16xbf16>
    %79 = vector.extract_strided_slice %33 {offsets = [0, 0, 16], sizes = [1, 8, 16], strides = [1, 1, 1]} : vector<1x8x32xbf16> to vector<1x8x16xbf16>
    %80 = vector.extract_strided_slice %37 {offsets = [0, 0, 16], sizes = [1, 1, 16], strides = [1, 1, 1]} : vector<1x1x32xbf16> to vector<1x1x16xbf16>
    "tpu.trace_start"() <{level = 10 : i32, message = "bqd,bkd->bqk"}> : () -> ()
    %cst_41 = arith.constant dense<0.000000e+00> : vector<1x8x8xf32>
    %81 = tpu.matmul %76, %77, %cst_41 {dimension_numbers = #tpu.dot_dimension_numbers<[2], [2], [1], [1], [0, 0, 0, 1, 1, 1], [0], [0]>} : vector<1x8x16xbf16>, vector<1x8x16xbf16>, vector<1x8x8xf32> -> vector<1x8x8xf32>
    "tpu.trace_stop"() : () -> ()
    "tpu.trace_start"() <{level = 10 : i32, message = "bqd,bgd->bqg"}> : () -> ()
    %cst_42 = arith.constant dense<0.000000e+00> : vector<1x8x1xf32>
    %82 = tpu.matmul %76, %78, %cst_42 {dimension_numbers = #tpu.dot_dimension_numbers<[2], [2], [1], [1], [0, 0, 0, 1, 1, 1], [0], [0]>} : vector<1x8x16xbf16>, vector<1x1x16xbf16>, vector<1x8x1xf32> -> vector<1x8x1xf32>
    "tpu.trace_stop"() : () -> ()
    %cst_43 = arith.constant dense<0xFF800000> : vector<1x8xf32>
    %83 = vector.multi_reduction <maximumf>, %81, %cst_43 [2] : vector<1x8x8xf32> to vector<1x8xf32>
    %84 = vector.shape_cast %83 : vector<1x8xf32> to vector<1x8x1xf32>
    %cst_44 = arith.constant dense<0xFF800000> : vector<1x8xf32>
    %85 = vector.multi_reduction <maximumf>, %82, %cst_44 [2] : vector<1x8x1xf32> to vector<1x8xf32>
    %86 = vector.shape_cast %85 : vector<1x8xf32> to vector<1x8x1xf32>
    %87 = arith.maximumf %84, %86 : vector<1x8x1xf32>
    %88 = vector.broadcast %87 : vector<1x8x1xf32> to vector<1x8x8xf32>
    %89 = arith.subf %81, %88 : vector<1x8x8xf32>
    %90 = math.exp %89 : vector<1x8x8xf32>
    %91 = arith.subf %82, %87 : vector<1x8x1xf32>
    %92 = math.exp %91 : vector<1x8x1xf32>
    %cst_45 = arith.constant dense<0.000000e+00> : vector<1x8xf32>
    %93 = vector.multi_reduction <add>, %90, %cst_45 [2] : vector<1x8x8xf32> to vector<1x8xf32>
    %94 = vector.shape_cast %93 : vector<1x8xf32> to vector<1x8x1xf32>
    %cst_46 = arith.constant dense<0.000000e+00> : vector<1x8xf32>
    %95 = vector.multi_reduction <add>, %92, %cst_46 [2] : vector<1x8x1xf32> to vector<1x8xf32>
    %96 = vector.shape_cast %95 : vector<1x8xf32> to vector<1x8x1xf32>
    %97 = arith.addf %94, %96 : vector<1x8x1xf32>
    %98 = tpu.reciprocal %97 {approx = true} : vector<1x8x1xf32> -> vector<1x8x1xf32>
    %99 = arith.mulf %97, %98 : vector<1x8x1xf32>
    %cst_47 = arith.constant 2.000000e+00 : f32
    %100 = vector.broadcast %cst_47 : f32 to vector<1x8x1xf32>
    %101 = arith.subf %100, %99 : vector<1x8x1xf32>
    %102 = arith.mulf %98, %101 : vector<1x8x1xf32>
    %103 = vector.broadcast %102 : vector<1x8x1xf32> to vector<1x8x8xf32>
    %104 = arith.mulf %90, %103 : vector<1x8x8xf32>
    %105 = arith.truncf %104 : vector<1x8x8xf32> to vector<1x8x8xbf16>
    %106 = arith.mulf %92, %102 : vector<1x8x1xf32>
    %107 = arith.truncf %106 : vector<1x8x1xf32> to vector<1x8x1xbf16>
    "tpu.trace_start"() <{level = 10 : i32, message = "bqk,bkd->bqd"}> : () -> ()
    %cst_48 = arith.constant dense<0.000000e+00> : vector<1x8x16xf32>
    %108 = tpu.matmul %105, %79, %cst_48 {dimension_numbers = #tpu.dot_dimension_numbers<[2], [1], [1], [2], [0, 0, 0, 1, 1, 2], [0], [0]>} : vector<1x8x8xbf16>, vector<1x8x16xbf16>, vector<1x8x16xf32> -> vector<1x8x16xf32>
    "tpu.trace_stop"() : () -> ()
    "tpu.trace_start"() <{level = 10 : i32, message = "bqg,bgd->bqd"}> : () -> ()
    %cst_49 = arith.constant dense<0.000000e+00> : vector<1x8x16xf32>
    %109 = tpu.matmul %107, %80, %cst_49 {dimension_numbers = #tpu.dot_dimension_numbers<[2], [1], [1], [2], [0, 0, 0, 1, 1, 2], [0], [0]>} : vector<1x8x1xbf16>, vector<1x1x16xbf16>, vector<1x8x16xf32> -> vector<1x8x16xf32>
    "tpu.trace_stop"() : () -> ()
    %110 = arith.addf %108, %109 : vector<1x8x16xf32>
    %111 = vector.shape_cast %110 : vector<1x8x16xf32> to vector<8x16xf32>
    %112 = arith.truncf %111 : vector<8x16xf32> to vector<8x16xbf16>
    %c0_50 = arith.constant 0 : index
    %c16 = arith.constant 16 : index
    %113 = vector.load %arg16[%c0_50, %c16] : memref<8x32xbf16, #tpu.memory_space<vmem>>, vector<8x16xbf16>
    tpu.vector_store %arg16[%c0_50, %c16], %112 {strides = array<i32>} : memref<8x32xbf16, #tpu.memory_space<vmem>>, vector<8x16xbf16>,
    %c0_51 = arith.constant 0 : index
    %c0_52 = arith.constant 0 : index
    %114 = vector.load %arg16[%c0_51, %c0_52] : memref<8x32xbf16, #tpu.memory_space<vmem>>, vector<8x32xbf16>
    %c0_53 = arith.constant 0 : index
    %c0_54 = arith.constant 0 : index
    %115 = vector.load %arg13[%c0_53, %c0_54] : memref<32x128xbf16, #tpu.memory_space<vmem>>, vector<32x128xbf16>
    %cst_55 = arith.constant dense<0.000000e+00> : vector<8x128xf32>
    %116 = tpu.matmul %114, %115, %cst_55 {dimension_numbers = #tpu.dot_dimension_numbers<[1], [0], [0], [1], [0, 0, 1, 1], [], []>} : vector<8x32xbf16>, vector<32x128xbf16>, vector<8x128xf32> -> vector<8x128xf32>
    %c0_56 = arith.constant 0 : index
    %c0_57 = arith.constant 0 : index
    %117 = vector.load %arg14[%c0_56, %c0_57] : memref<1x128xf32, #tpu.memory_space<vmem>>, vector<1x128xf32>
    %118 = vector.broadcast %117 : vector<1x128xf32> to vector<8x128xf32>
    %119 = arith.addf %116, %118 : vector<8x128xf32>
    %120 = vector.shape_cast %119 : vector<8x128xf32> to vector<1x8x128xf32>
    %c0_58 = arith.constant 0 : index
    %c0_59 = arith.constant 0 : index
    %c0_60 = arith.constant 0 : index
    %121 = vector.load %arg15[%c0_58, %c0_59, %c0_60] : memref<1x8x128xf32, #tpu.memory_space<vmem>>, vector<1x8x128xf32>
    tpu.vector_store %arg15[%c0_58, %c0_59, %c0_60], %120 {strides = array<i32>} : memref<1x8x128xf32, #tpu.memory_space<vmem>>, vector<1x8x128xf32>,
    return
  }
  func.func @transform_0(%arg0: i32) -> (i32, i32, i32) {
    %c0_i32 = arith.constant 0 : i32
    %c0_i32_0 = arith.constant 0 : i32
    %c0_i32_1 = arith.constant 0 : i32
    return %arg0, %c0_i32, %c0_i32_0 : i32, i32, i32
  }
  func.func @transform_1(%arg0: i32) -> (i32, i32, i32) {
    %c0_i32 = arith.constant 0 : i32
    %c0_i32_0 = arith.constant 0 : i32
    %c0_i32_1 = arith.constant 0 : i32
    return %arg0, %c0_i32, %c0_i32_0 : i32, i32, i32
  }
  func.func @transform_2(%arg0: i32) -> (i32, i32, i32) {
    %c0_i32 = arith.constant 0 : i32
    %c0_i32_0 = arith.constant 0 : i32
    %c0_i32_1 = arith.constant 0 : i32
    return %arg0, %c0_i32, %c0_i32_0 : i32, i32, i32
  }
  func.func @transform_3(%arg0: i32) -> (i32, i32, i32) {
    %c0_i32 = arith.constant 0 : i32
    %c0_i32_0 = arith.constant 0 : i32
    %c0_i32_1 = arith.constant 0 : i32
    return %arg0, %c0_i32, %c0_i32_0 : i32, i32, i32
  }
  func.func @transform_4(%arg0: i32) -> (i32, i32) {
    %c0_i32 = arith.constant 0 : i32
    %c0_i32_0 = arith.constant 0 : i32
    %c0_i32_1 = arith.constant 0 : i32
    return %c0_i32, %c0_i32_0 : i32, i32
  }
  func.func @transform_5(%arg0: i32) -> (i32, i32) {
    %c0_i32 = arith.constant 0 : i32
    %c0_i32_0 = arith.constant 0 : i32
    %c0_i32_1 = arith.constant 0 : i32
    return %c0_i32, %c0_i32_0 : i32, i32
  }
  func.func @transform_6(%arg0: i32) -> (i32, i32) {
    %c0_i32 = arith.constant 0 : i32
    %c0_i32_0 = arith.constant 0 : i32
    %c0_i32_1 = arith.constant 0 : i32
    return %c0_i32, %c0_i32_0 : i32, i32
  }
  func.func @transform_7(%arg0: i32) -> (i32, i32) {
    %c0_i32 = arith.constant 0 : i32
    %c0_i32_0 = arith.constant 0 : i32
    %c0_i32_1 = arith.constant 0 : i32
    return %c0_i32, %c0_i32_0 : i32, i32
  }
  func.func @transform_8(%arg0: i32) -> (i32, i32) {
    %c0_i32 = arith.constant 0 : i32
    %c0_i32_0 = arith.constant 0 : i32
    %c0_i32_1 = arith.constant 0 : i32
    return %c0_i32, %c0_i32_0 : i32, i32
  }
  func.func @transform_9(%arg0: i32) -> (i32, i32) {
    %c0_i32 = arith.constant 0 : i32
    %c0_i32_0 = arith.constant 0 : i32
    %c0_i32_1 = arith.constant 0 : i32
    return %c0_i32, %c0_i32_0 : i32, i32
  }
  func.func @transform_10(%arg0: i32) -> (i32, i32) {
    %c0_i32 = arith.constant 0 : i32
    %c0_i32_0 = arith.constant 0 : i32
    %c0_i32_1 = arith.constant 0 : i32
    return %c0_i32, %c0_i32_0 : i32, i32
  }
  func.func @transform_11(%arg0: i32) -> (i32, i32) {
    %c0_i32 = arith.constant 0 : i32
    %c0_i32_0 = arith.constant 0 : i32
    %c0_i32_1 = arith.constant 0 : i32
    return %c0_i32, %c0_i32_0 : i32, i32
  }
  func.func @transform_12(%arg0: i32) -> (i32, i32) {
    %c0_i32 = arith.constant 0 : i32
    %c0_i32_0 = arith.constant 0 : i32
    %c0_i32_1 = arith.constant 0 : i32
    return %c0_i32, %c0_i32_0 : i32, i32
  }
  func.func @transform_13(%arg0: i32) -> (i32, i32) {
    %c0_i32 = arith.constant 0 : i32
    %c0_i32_0 = arith.constant 0 : i32
    %c0_i32_1 = arith.constant 0 : i32
    return %c0_i32, %c0_i32_0 : i32, i32
  }
  func.func @transform_14(%arg0: i32) -> (i32, i32, i32) {
    %c0_i32 = arith.constant 0 : i32
    %c0_i32_0 = arith.constant 0 : i32
    %c0_i32_1 = arith.constant 0 : i32
    return %arg0, %c0_i32, %c0_i32_0 : i32, i32, i32
  }
}

</mosaic_0001>

<bundles_post_ra>
// kernel: tpu_custom_call.1
= control target key start
LH: loop header
LB: loop body
LE: loop exit
PB: predicated region body
PF: predicated region fallthrough
CT: control target
= control target key end

     0   :  { %s2743_s0 = inlined_call_operand.hbm [shape: bf16[2,8,32], index: 0, kind: input, shape index: {}]   ;;  %s2744_s1 = inlined_call_operand.hbm [shape: bf16[2,8,32], index: 1, kind: input, shape index: {}]   ;;  %s2745_s2 = inlined_call_operand.hbm [shape: bf16[2,8,32], index: 2, kind: input, shape index: {}]   ;;  %s2746_s3 = inlined_call_operand.vmem [shape: bf16[2,1,32], index: 3, kind: input, shape index: {}]   ;;  %s2747_s4 = inlined_call_operand.hbm [shape: bf16[32,32], index: 4, kind: input, shape index: {}]   ;;  %s2748_s5 = inlined_call_operand.vmem [shape: f32[1,32], index: 5, kind: input, shape index: {}]   ;;  %s2749_s6 = inlined_call_operand.hbm [shape: bf16[32,32], index: 6, kind: input, shape index: {}]   ;;  %s2750_s7 = inlined_call_operand.hbm [shape: f32[1,32], index: 7, kind: input, shape index: {}]   ;;  %s2751_s8 = inlined_call_operand.vmem [shape: bf16[32,64], index: 8, kind: input, shape index: {}]   ;;  %s2752_s9 = inlined_call_operand.vmem [shape: f32[1,64], index: 9, kind: input, shape index: {}]   ;;  %s2753_s10 = inlined_call_operand.hbm [shape: bf16[32,32], index: 10, kind: input, shape index: {}]   ;;  %s2754_s11 = inlined_call_operand.vmem [shape: f32[1,32], index: 11, kind: input, shape index: {}]   ;;  %s2755_s12 = inlined_call_operand.hbm [shape: bf16[32,128], index: 12, kind: input, shape index: {}]   ;;  %s2756_s13 = inlined_call_operand.vmem [shape: f32[1,128], index: 13, kind: input, shape index: {}]   ;;  %s2757_s14 = inlined_call_operand.hbm [shape: f32[2,8,128], index: 14, kind: output, shape index: {}]  }
   0x1   :  { %2781 = sst [smem:[#allocation30_spill]] %s2744_s1 }
   0x2   :  { %2782 = sst [smem:[#allocation31_spill]] %s2747_s4 }
   0x3   :  { %2783 = sst [smem:[#allocation32_spill]] %s2748_s5 }
   0x4   :  { %2784 = sst [smem:[#allocation33_spill]] %s2750_s7 }
   0x5   :  { %2785 = sst [smem:[#allocation34_spill]] %s2752_s9 }
   0x6   :  { %2786 = sst [smem:[#allocation35_spill]] %s2754_s11 }
   0x7   :  { %2787 = sst [smem:[#allocation36_spill]] %s2756_s13 }
   0x8   :  { %2788 = sst [smem:[#allocation37_spill]] %s2757_s14 }
   0x9   :  { %19 = vsyncpa [#allocation4], 0 }
   0xa   :  { %21 = vsyncpa [#allocation4 + $0x1], 0 }
   0xb   :  { %22 = vsyncpa [#allocation7], 0 }
   0xc   :  { %24 = vsyncpa [#allocation7 + $0x1], 0 }
   0xd   :  { %25 = vsyncpa [#allocation10], 0 }
   0xe   :  { %26 = vsyncpa [#allocation13], 0 }
   0xf   :  { %27 = vsyncpa [#allocation16], 0 }
  0x10   :  { %28 = vsyncpa [#allocation5], 0 }
  0x11   :  { %30 = vsyncpa [#allocation5 + $0x1], 0  ;;  %s2327_s29 = smov 0   ;;  %s2329_s30 = smov 0  }
  0x12   :  { %s2331_s15 = smov 0   ;;  %s2333_s16 = smov 0  }
  0x13 LB: > { %2789 = sst [smem:[#allocation24_spill]] %s2220_s29  ;;  %s2234_s17 = smov [#allocation9]   ;;  %s2232_s16 = sphi %s2333_s16, %s2832_s16   ;;  %s2228_s15 = sphi %s2331_s15, %s2836_s15   ;;  %s2224_s30 = sphi %s2329_s30, %s2835_s30   ;;  %s2220_s29 = sphi %s2327_s29, %s2834_s29  }
  0x14   : > { %2790 = sst [smem:[#allocation25_spill]] %s2232_s16  ;;  %s393_s18 = sshll.u32 %s2234_s17, 4  ;;  %s394_s18 = int_to_ptr.vmem [resolvable:$true] %s393_s18 }
  0x15   : > { %s2348_s19 = sadd.s32 4294967295, %s2232_s16   ;;  %p1623_p0 = scmp.ge.s32.totalorder %s2232_s16, 1 }
  0x16   : > { %p2772_p1 = scmp.eq.s32.totalorder %s2348_s19, 0  ;;  %p381_p2 = scmp.lt.s32.totalorder %s2232_s16, 3 }
  0x17   : > { %s2235_s21 = smov [#allocation12]   ;;  %s1949_s25 = scalar_lea.vmem %s394_s18, 256 }
  0x18   : > { %p2353_p3 = pnand %p1623_p0, %p381_p2  ;;  %s423_s22 = sshll.u32 %s2235_s21, 4  ;;  %s424_s22 = int_to_ptr.vmem [resolvable:$true] %s423_s22 }
  0x19   : > { %p1950_p8 = scmp.ne.s32.totalorder %s394_s18, %s1949_s25  ;;  %p1957_p11 = scmp.lt.s32.totalorder %s394_s18, %s394_s18 }
  0x1a   : > { %s2791_s20 = scalar_select %p2353_p3, 1, 0 }
  0x1b   : > { %p1826_p5 = pneg %p2353_p3  ;;  %p1958_p12 = scmp.lt.s32.totalorder %s1949_s25, %s1949_s25 }
  0x1d   : > { %p2362_p6 = pnand %p1826_p5, %p2772_p1  ;;  %p1959_p13 = por %p1958_p12, %p1957_p11 }
  0x1f   : > { %s2792_s23 = scalar_select %p2362_p6, 1, 0 }
  0x20   : > { %p2368_p7 = pneg %p2362_p6 }
  0x22   : > { %s2793_s24 = scalar_select %p2368_p7, 1, 0 }
  0x23   : > { %p1952_p9 = pnand %p1950_p8, %p2368_p7 }
  0x25   : > { %p1953_p10 = pneg %p1952_p9 }
  0x27   : > { %p1960_p0 = pnand %p1959_p13, %p1953_p10 }
  0x29   : > { %1963 = shalt.err (!%p1960_p0)
}
  0x2a   : > { %s2760_s26 = smov 64   ;;  %s2762_s27 = smov 4  }
  0x2b   : > { %s2794_s4 = sld [smem:[#allocation31_spill]]  ;;  %s1975_s21 = scalar_lea.vmem %s424_s22, 16 }
  0x2c   : > { %p1976_p2 = scmp.ne.s32.totalorder %s424_s22, %s1975_s21  ;;  %s1982_s25 = scalar_lea.vmem %s424_s22, 32 }
  0x2d   : > { %p1983_p9 = scmp.lt.s32.totalorder %s424_s22, %s424_s22  ;;  %p1984_p10 = scmp.lt.s32.totalorder %s1982_s25, %s1975_s21 }
  0x2e   : > { %p1978_p5 = pnand %p1976_p2, %p2368_p7 }
  0x2f   : > { %p1985_p11 = por %p1984_p10, %p1983_p9 }
  0x30   : > { %p1979_p8 = pneg %p1978_p5 }
  0x31   : > { %1829 = dma.hbm_to_vmem [thread:$0]  (!%p2362_p6), %s2794_s4, 256, %s394_s18, [#allocation10], %s2760_s26, %s2760_s26, %s2762_s27  }
  0x32   : > { %p1986_p12 = pnand %p1985_p11, %p1979_p8 }
  0x34   : > { %1989 = shalt.err (!%p1986_p12)
}
  0x35   : > { %s2795_s7 = sld [smem:[#allocation33_spill]]  ;;  %s1622_s18 = sadd.s32 4294967294, %s2232_s16  }
  0x36   : > { %s2391_s28 = sadd.s32 1, %s2232_s16   ;;  %s43_s14 = sadd.s32 1, %s2228_s15 }
  0x37   : > { %2796 = sst [smem:[#allocation26_spill]] %s2391_s28  ;;  %s40_s13 = ssub.s32 %s2232_s16, %s2391_s28 }
  0x38   : > { %p41_p13 = scmp.eq.s32.totalorder %s40_s13, 0  ;;  %p50_p0 = scmp.ne.s32.totalorder %s2228_s15, %s2224_s30 }
  0x39   : > { %p51_p2 = scmp.eq.s32.totalorder %s2232_s16, 0  ;;  %p56_p5 = scmp.ne.s32.totalorder %s2224_s30, %s2220_s29 }
  0x3a   : > { %s2402_s17 = scalar_select %p41_p13, %s2228_s15, %s43_s14  }
  0x3b   : > { %1835 = dma.hbm_to_vmem [thread:$0]  (!%p2362_p6), %s2795_s7, 16, %s424_s22, [#allocation13]  }
  0x3c   : > { %2797 = sst [smem:[#allocation27_spill]] %s2402_s17  ;;  %p52_p8 = por %p51_p2, %p50_p0 }
  0x3d   : > { %p2406_p9 = por %p2772_p1, %p56_p5  ;;  %p368_p10 = scmp.eq.s32.totalorder %s2348_s19, 1 }
  0x3e   : > { %p374_p11 = scmp.eq.s32.totalorder %s1622_s18, 1  ;;  %p1861_p12 = scmp.lt.s32.totalorder %s2232_s16, 2 }
  0x3f   : > { %s2798_s21 = scalar_select %p2406_p9, 1, 0 }
  0x40   : > { %s2764_s22 = sand.u32 1, %s2228_s15   ;;  %p2413_p4 = por %p368_p10, %p50_p0 }
  0x41   : > { %p2417_p3 = por %p374_p11, %p56_p5  ;;  %s2423_s14 = sshll.u32 %s2764_s22, 2 }
  0x42   : > { %s2799_s25 = scalar_select %p2413_p4, 1, 0 }
  0x43   : > { %s2801_s13 = scalar_select %p2417_p3, 1, 0 }
  0x44   : > { %2800 = sst [smem:[#allocation28_spill]] %s2799_s25  ;;  %s2426_s26 = sshll.u32 %s2232_s16, 6 }
  0x45   : > { %2802 = sst [smem:[#allocation29_spill]] %s2801_s13  ;;  %p2428_p13 = pnand %p1861_p12, %p52_p8 }
  0x46   : > { %s490_s18 = sand.u32 1, %s2232_s16   ;;  %s2804_s1 = sld [smem:[#allocation30_spill]] }
  0x47   : > { %s494_s22 = scalar_lea.vmem [#allocation6], %s2423_s14  ;;  %s2238_s13 = smov [#allocation11]  }
  0x48   : > { %s501_s28 = sshll.u32 %s494_s22, 4  ;;  %s409_s29 = sshll.u32 %s2238_s13, 4  ;;  %s2440_s28 = int_to_ptr.vmem [resolvable:$true] %s501_s28  ;;  %s410_s29 = int_to_ptr.vmem [resolvable:$true] %s409_s29 }
  0x49   : > { %s2442_s25 = scalar_lea.sflag [#allocation7], %s490_s18  ;;  %p2448_p2 = pneg %p2428_p13 }
  0x4b   : > { %s2805_s16 = scalar_select %p2448_p2, 1, 0 }
  0x4c   : > { %s2437_s17 = scalar_lea.hbm %s2804_s1, %s2426_s26  ;;  %s1995_s22 = scalar_lea.hbm %s2804_s1, 128 }
  0x4d   : > { %s1990_s11 = scalar_lea.hbm %s2437_s17, 64  ;;  %p1996_p10 = scmp.lt.s32.totalorder %s2437_s17, %s2804_s1 }
  0x4e   : > { %p1991_p0 = scmp.ne.s32.totalorder %s2437_s17, %s1990_s11  ;;  %p1997_p11 = scmp.lt.s32.totalorder %s1995_s22, %s1990_s11 }
  0x50   : > { %p1993_p5 = pnand %p2448_p2, %p1991_p0  ;;  %p1998_p12 = por %p1997_p11, %p1996_p10 }
  0x52   : > { %p1994_p8 = pneg %p1993_p5 }
  0x54   : > { %p1999_p1 = pnand %p1998_p12, %p1994_p8 }
  0x56   : > { %2002 = shalt.err (!%p1999_p1)
}
  0x57   : > { %s2003_s13 = scalar_lea.vmem %s2440_s28, 64  ;;  %s2239_s18 = smov [#allocation6]  }
  0x58   : > { %p2004_p3 = scmp.ne.s32.totalorder %s2440_s28, %s2003_s13  ;;  %s2008_s4 = sshll.u32 %s2239_s18, 4  ;;  %s2009_s4 = int_to_ptr.vmem [resolvable:$false] %s2008_s4 }
  0x59   : > { %s2010_s7 = scalar_lea.vmem %s2009_s4, 128  ;;  %p2011_p4 = scmp.lt.s32.totalorder %s2440_s28, %s2009_s4 }
  0x5a   : > { %p2006_p0 = pnand %p2004_p3, %p2448_p2  ;;  %p2012_p9 = scmp.lt.s32.totalorder %s2010_s7, %s2003_s13 }
  0x5c   : > { %p2007_p5 = pneg %p2006_p0  ;;  %p2013_p6 = por %p2012_p9, %p2011_p4 }
  0x5e   : > { %p2014_p7 = pnand %p2013_p6, %p2007_p5 }
  0x60   : > { %2017 = shalt.err (!%p2014_p7)
}
  0x61   : > { %1848 = dma.hbm_to_vmem [thread:$0]  (!%p2428_p13), %s2437_s17, 64, %s2440_s28, %s2442_s25  }
  0x62   : > { %s2029_s5 = scalar_lea.vmem %s410_s29, 256  ;;  %p2806_p3 = scmp.ne.s32.totalorder %s2793_s24, 0 }
  0x63   : > { %p2030_p1 = scmp.ne.s32.totalorder %s410_s29, %s2029_s5  ;;  %p2037_p11 = scmp.lt.s32.totalorder %s410_s29, %s410_s29 }
  0x64   : > { %p2038_p12 = scmp.lt.s32.totalorder %s2029_s5, %s2029_s5 }
  0x65   : > { %p2032_p8 = pnand %p2030_p1, %p2806_p3 }
  0x66   : > { %p2039_p0 = por %p2038_p12, %p2037_p11 }
  0x67   : > { %p2033_p10 = pneg %p2032_p8 }
  0x69   : > { %p2040_p2 = pnand %p2039_p0, %p2033_p10 }
  0x6b   : > { %2043 = shalt.err (!%p2040_p2)
}
  0x6c   : > { %p2807_p4 = scmp.ne.s32.totalorder %s2792_s23, 0  ;;  %s2808_s9 = smov 4  }
  0x6d   : > { %s2809_s11 = smov 64   ;;  %s2240_s28 = smov [#allocation14]  }
  0x6e   : > { %1832 = dma.hbm_to_vmem [thread:$0]  (!%p2807_p4), %s2749_s6, 256, %s410_s29, [#allocation10], %s2809_s11, %s2809_s11, %s2808_s9  }
  0x6f   : > { %s439_s17 = sshll.u32 %s2240_s28, 4  ;;  %s2241_s18 = smov [#allocation15]   ;;  %s440_s17 = int_to_ptr.vmem [resolvable:$true] %s439_s17 }
  0x70   : > { %s455_s4 = sshll.u32 %s2241_s18, 4  ;;  %s2055_s7 = scalar_lea.vmem %s440_s17, 256  ;;  %s456_s4 = int_to_ptr.vmem [resolvable:$true] %s455_s4 }
  0x71   : > { %p2056_p6 = scmp.ne.s32.totalorder %s440_s17, %s2055_s7  ;;  %p2063_p2 = scmp.lt.s32.totalorder %s440_s17, %s440_s17 }
  0x72   : > { %p2064_p5 = scmp.lt.s32.totalorder %s2055_s7, %s2055_s7 }
  0x73   : > { %p2058_p7 = pnand %p2056_p6, %p2806_p3 }
  0x74   : > { %p2065_p1 = por %p2064_p5, %p2063_p2 }
  0x75   : > { %p2059_p9 = pneg %p2058_p7 }
  0x77   : > { %p2066_p8 = pnand %p2065_p1, %p2059_p9 }
  0x79   : > { %2069 = shalt.err (!%p2066_p8)
}
  0x7a   : > { %1838 = dma.hbm_to_vmem [thread:$0]  (!%p2807_p4), %s2753_s10, 256, %s440_s17, [#allocation13], %s2809_s11, %s2809_s11, %s2808_s9  }
  0x7b   : > { %s2081_s22 = scalar_lea.vmem %s456_s4, 256  ;;  %p2089_p0 = scmp.lt.s32.totalorder %s456_s4, %s456_s4 }
  0x7c   : > { %p2082_p10 = scmp.ne.s32.totalorder %s456_s4, %s2081_s22  ;;  %p2090_p6 = scmp.lt.s32.totalorder %s2081_s22, %s2081_s22 }
  0x7e   : > { %p2084_p11 = pnand %p2082_p10, %p2806_p3  ;;  %p2091_p7 = por %p2090_p6, %p2089_p0 }
  0x80   : > { %p2085_p12 = pneg %p2084_p11 }
  0x82   : > { %p2092_p9 = pnand %p2091_p7, %p2085_p12 }
  0x84   : > { %2095 = shalt.err (!%p2092_p9)
}
  0x85   : > { %1841 = dma.hbm_to_vmem [thread:$0]  (!%p2807_p4), %s2755_s12, 256, %s456_s4, [#allocation16], %s2809_s11, %s2809_s11, %s2808_s9  }
  0x86   : > { %s2505_s18 = scalar_lea.hbm %s2743_s0, %s2426_s26  ;;  %s476_s23 = scalar_lea.vmem [#allocation3], %s2423_s14 }
  0x87   : > { %s483_s7 = sshll.u32 %s476_s23, 4  ;;  %s2512_s22 = scalar_lea.hbm %s2745_s2, %s2426_s26  ;;  %s484_s7 = int_to_ptr.vmem [resolvable:$true] %s483_s7 }
  0x88   : > { %s2810_s13 = sand.u32 1, %s2228_s15   ;;  %s2096_s1 = scalar_lea.hbm %s2505_s18, 64 }
  0x89   : > { %s473_s28 = scalar_lea.sflag [#allocation4], %s2810_s13  ;;  %p2097_p3 = scmp.ne.s32.totalorder %s2505_s18, %s2096_s1 }
  0x8a   : > { %p2811_p4 = scmp.ne.s32.totalorder %s2805_s16, 0  ;;  %s2101_s4 = scalar_lea.hbm %s2743_s0, 128 }
  0x8b   : > { %p2102_p1 = scmp.lt.s32.totalorder %s2505_s18, %s2743_s0  ;;  %p2103_p8 = scmp.lt.s32.totalorder %s2101_s4, %s2096_s1 }
  0x8c   : > { %p2099_p2 = pnand %p2097_p3, %p2811_p4 }
  0x8d   : > { %p2104_p10 = por %p2103_p8, %p2102_p1 }
  0x8e   : > { %p2100_p5 = pneg %p2099_p2 }
  0x90   : > { %p2105_p11 = pnand %p2104_p10, %p2100_p5 }
  0x92   : > { %2108 = shalt.err (!%p2105_p11)
}
  0x93   : > { %s2109_s26 = scalar_lea.vmem %s484_s7, 64  ;;  %s2242_s23 = smov [#allocation3]  }
  0x94   : > { %p2110_p12 = scmp.ne.s32.totalorder %s484_s7, %s2109_s26  ;;  %s2114_s29 = sshll.u32 %s2242_s23, 4  ;;  %s2115_s29 = int_to_ptr.vmem [resolvable:$false] %s2114_s29 }
  0x95   : > { %s2116_s5 = scalar_lea.vmem %s2115_s29, 128  ;;  %p2117_p7 = scmp.lt.s32.totalorder %s484_s7, %s2115_s29 }
  0x96   : > { %p2112_p0 = pnand %p2110_p12, %p2811_p4  ;;  %p2118_p9 = scmp.lt.s32.totalorder %s2116_s5, %s2109_s26 }
  0x98   : > { %p2113_p6 = pneg %p2112_p0  ;;  %p2119_p3 = por %p2118_p9, %p2117_p7 }
  0x9a   : > { %p2120_p2 = pnand %p2119_p3, %p2113_p6 }
  0x9c   : > { %2123 = shalt.err (!%p2120_p2)
}
  0x9d   : > { %1845 = dma.hbm_to_vmem [thread:$0]  (!%p2428_p13), %s2505_s18, 64, %s484_s7, %s473_s28  }
  0x9e   : > { %s512_s1 = scalar_lea.vmem [#allocation8], %s2423_s14  ;;  %s2124_s9 = scalar_lea.hbm %s2512_s22, 64 }
  0x9f   : > { %s519_s13 = sshll.u32 %s512_s1, 4  ;;  %p2125_p5 = scmp.ne.s32.totalorder %s2512_s22, %s2124_s9  ;;  %s520_s13 = int_to_ptr.vmem [resolvable:$true] %s519_s13 }
  0xa0   : > { %s2129_s24 = scalar_lea.hbm %s2745_s2, 128  ;;  %p2130_p10 = scmp.lt.s32.totalorder %s2512_s22, %s2745_s2 }
  0xa1   : > { %p2127_p1 = pnand %p2125_p5, %p2811_p4  ;;  %p2131_p11 = scmp.lt.s32.totalorder %s2129_s24, %s2124_s9 }
  0xa3   : > { %p2128_p8 = pneg %p2127_p1  ;;  %p2132_p12 = por %p2131_p11, %p2130_p10 }
  0xa5   : > { %p2133_p0 = pnand %p2132_p12, %p2128_p8 }
  0xa7   : > { %2136 = shalt.err (!%p2133_p0)
}
  0xa8   : > { %s2137_s14 = scalar_lea.vmem %s520_s13, 64  ;;  %s2243_s18 = smov [#allocation8]  }
  0xa9   : > { %p2138_p6 = scmp.ne.s32.totalorder %s520_s13, %s2137_s14  ;;  %s2142_s7 = sshll.u32 %s2243_s18, 4  ;;  %s2143_s7 = int_to_ptr.vmem [resolvable:$false] %s2142_s7 }
  0xaa   : > { %s2144_s28 = scalar_lea.vmem %s2143_s7, 128  ;;  %p2145_p3 = scmp.lt.s32.totalorder %s520_s13, %s2143_s7 }
  0xab   : > { %p2140_p7 = pnand %p2138_p6, %p2811_p4  ;;  %p2146_p2 = scmp.lt.s32.totalorder %s2144_s28, %s2137_s14 }
  0xad   : > { %p2141_p9 = pneg %p2140_p7  ;;  %p2147_p5 = por %p2146_p2, %p2145_p3 }
  0xaf   : > { %p2148_p1 = pnand %p2147_p5, %p2141_p9 }
  0xb1   : > { %2151 = shalt.err (!%p2148_p1)
}
  0xb2   : > { %1851 = dma.hbm_to_vmem [thread:$0]  (!%p2428_p13), %s2512_s22, 64, %s520_s13, %s2442_s25  }
  0xb3   : > { %p2812_p8 = scmp.ne.s32.totalorder %s2791_s20, 0 }
  0xb4   : > { %s2553_s16 = sand.u32 (!%p2812_p8), 1, %s2224_s30   ;;  %p2813_p4 = scmp.ne.s32.totalorder (!%p2812_p8), %s2798_s21, 0 }
  0xb5   : > { %534 = sbr.rel (%p2812_p8) target bundleno = 2362 (0x93a), region = 76  ;;  %s2556_s23 = sshll.u32 (!%p2812_p8), %s2553_s16, 2 }
  0xb6   : > { %s537_s29 = scalar_lea.sflag (!%p2812_p8), [#allocation4], %s2553_s16  ;;  %s540_s5 = scalar_lea.vmem (!%p2812_p8), [#allocation3], %s2556_s23 }
  0xba   : > { %2195 = dma.done.wait (%p2813_p4), %s537_s29, 64  }
  0xbb   : > { %2197 = vsyncadd (%p2813_p4), %s537_s29, 4294967232  ;;  %s545_s20 = sand.u32 1, %s2348_s19   ;;  %s549_s25 = scalar_lea.vmem [#allocation6], %s2556_s23 }
  0xbc   : > { %s546_s27 = scalar_lea.sflag [#allocation7], %s545_s20 }
  0xbd   : > { %2199 = dma.done.wait (%p2813_p4), %s546_s27, 128  }
  0xbe   : > { %2201 = vsyncadd (%p2813_p4), %s546_s27, 4294967168  ;;  %s558_s22 = scalar_lea.vmem [#allocation8], %s2556_s23  ;;  %p2814_p13 = scmp.eq.s32.totalorder %s2348_s19, 0 }
  0xc0   : > { %2203 = dma.done.wait (%p2814_p13), [#allocation10], 512   ;;  %p2815_p10 = pmov %p2814_p13 }
  0xc2   : > { %2205 = vsyncadd (%p2815_p10), [#allocation10], 4294966784  ;;  %p2816_p11 = pmov %p2815_p10 }
  0xc3   : > { %p2817_p12 = pmov %p2815_p10 }
  0xc4   : > { %2207 = dma.done.wait (%p2816_p11), [#allocation13], 272  }
  0xc5   : > { %2209 = vsyncadd (%p2817_p12), [#allocation13], 4294967024  ;;  %p2818_p0 = pmov %p2815_p10 }
  0xc7   : > { %2211 = dma.done.wait (%p2818_p0), [#allocation16], 256   ;;  %p2819_p6 = pmov %p2818_p0 }
  0xc8   : > { %v2244_v0 = vmov 0.0   ;;  %vm2245_vm0 = vmmov 0   ;;  %v1916_v1 = vld [vmem:[#allocation11 + $0x8] sm:$0xff]   ;;  %v1917_v2 = vld [vmem:[#allocation9 + $0x8] sm:$0xff]   ;;  %v1918_v3 = vld [vmem:[#allocation11] sm:$0xff]   ;;  %p636_p7 = scmp.lt.s32.totalorder %s2348_s19, 1 }
  0xc9   : > { %2213 = vsyncadd (%p2819_p6), [#allocation16], 4294967040  ;;  %1718 = vmatprep.subr.bf16.mxu1 %v2244_v0  ;;  %1710 = vmatprep.subr.bf16.mxu0 %v2244_v0  ;;  %v1919_v4 = vld [vmem:[#allocation9] sm:$0xff]   ;;  %vm667_vm1 = vcmask 261120   ;;  %v641_v5 = vld [vmem:[%s549_s25] sm:$0xf] }
  0xca   : > { %1722 = vmatprep.mubr.msk.bf16.mxu1 %vm2245_vm0, %v2244_v0  ;;  %1714 = vmatprep.mubr.msk.bf16.mxu0 %vm2245_vm0, %v2244_v0  ;;  %v1920_v6 = vld [vmem:[%s2751_s8 + $0x8] sm:$0xff]   ;;  %s637_s13 = scalar_select %p636_p7, %s2348_s19, 1  ;;  %v1921_v9 = vld [vmem:[%s2751_s8] sm:$0xff]   ;;  %v642_v12 = vld [vmem:[%s558_s22] sm:$0xf]  ;;  %vm907_vm2 = vcmask 130048  }
  0xcb   : > { %1719 = vmatpush3.bf16.msra.mxu1 %v1916_v1  ;;  %1711 = vmatpush3.bf16.msra.mxu0 %v1917_v2  ;;  %v640_v7 = vld [vmem:[%s540_s5] sm:$0xf]  ;;  %v1650_v13 = vld [vmem:[#allocation12] ss:$0 sm:$0xff]  ;;  %s2820_s18 = sld [smem:[#allocation32_spill]]  ;;  %vm1087_vm3 = vcmask 1043456  }
  0xcc   : > { %1720 = vmatprep.subr.bf16.mxu1 %v2244_v0  ;;  %1712 = vmatprep.subr.bf16.mxu0 %v2244_v0  ;;  %v1922_v8 = vld [vmem:[#allocation14 + $0x8] sm:$0xff]   ;;  %s638_s17 = scalar_lea.vmem %s2746_s3, %s637_s13  ;;  %v1923_v10 = vld [vmem:[#allocation14] sm:$0xff]   ;;  %s2821_s23 = sld [smem:[#allocation34_spill]]  ;;  %vm997_vm4 = vcmask 64512   ;;  %v2246_v52 = vmov 0   ;;  %vm1038_vm5 = vcmask 1040384  }
  0xcd   : > { %v643_v11 = vld [vmem:[%s638_s17] sm:$0x1]  ;;  %s2822_s20 = sld [smem:[#allocation35_spill]]  ;;  %1914 = vset.pattern.permute.xlu0 %v2246_v52  ;;  %1915 = vset.pattern.permute.xlu1 %v2246_v52  ;;  %s2247_s27 = smov 96   ;;  %vm1034_vm6 = vcmask 7168   ;;  %vm1132_vm7 = vcmask 125952  }
  0xce   : > { %s2248_s25 = smov 112   ;;  %s2249_s22 = smov 80   ;;  %vm1368_vm8 = vcmask 257152  }
  0xcf   : > { %1721 = vmatpush3.bf16.msra.mxu1 %v1918_v3  ;;  %1713 = vmatpush3.bf16.msra.mxu0 %v1919_v4  ;;  %v2656_v3 = vsel %vm1038_vm5, 65535, %v2246_v52  ;;  %s2250_s21 = smov 16   ;;  %s2823_s1 = sld [smem:[#allocation28_spill]] }
  0xd0   : > { %1734 = vmatprep.subr.bf16.mxu1 %v2244_v0  ;;  %1726 = vmatprep.subr.bf16.mxu0 %v2244_v0  ;;  %s1645_s13 = sshll.u32 %s2553_s16, 3  ;;  %s2824_s4 = sld [smem:[#allocation36_spill]] }
  0xd1   : > { %v1646_v17 = vld [vmem:[%s2820_s18] ss:$0 sm:$0xff]  ;;  %s1675_s24 = sshll.u32 %s2348_s19, 7  ;;  %s635_s17 = scalar_lea.vmem [#allocation17], %s1645_s13 }
  0xd2   : > { %1723 = vmatmul.mubr.msk.bf16.vlgmr.msra.gmra.mxu1 %vm667_vm1, %v641_v5  ;;  %1715 = vmatmul.mubr.msk.bf16.vlgmr.msra.gmra.mxu0 %vm667_vm1, %v640_v7  ;;  %v850_v26 = vld [vmem:[%s2821_s23] sm:$0x1]  ;;  %s1452_s26 = sshll.u32 %s635_s17, 4  ;;  %s2825_s7 = sld [smem:[#allocation37_spill]]  ;;  %s2702_s26 = int_to_ptr.vmem [resolvable:$true] %s1452_s26 }
  0xd3   : > { %1735 = vmatpush3.bf16.msra.mxu1 %v1920_v6  ;;  %1738 = vmatprep.mubr.msk.bf16.mxu1 %vm2245_vm0, %v2244_v0  ;;  %v1654_v29 = vld [vmem:[%s2822_s20] ss:$0 sm:$0xff]  ;;  %s1439_s23 = scalar_lea.sflag [#allocation5], %s2553_s16  ;;  %s2152_s29 = scalar_lea.vmem %s2702_s26, 128 }
  0xd4   : > { %1736 = vmatprep.subr.bf16.mxu1 %v2244_v0  ;;  %1727 = vmatpush3.bf16.msra.mxu0 %v1922_v8  ;;  %p2153_p9 = scmp.ne.s32.totalorder %s2702_s26, %s2152_s29  ;;  %s2251_s19 = smov [#allocation17]  }
  0xd5   : > { %1730 = vmatprep.mubr.msk.bf16.mxu0 %vm2245_vm0, %v2244_v0  ;;  %1728 = vmatprep.subr.bf16.mxu0 %v2244_v0  ;;  %p2826_p3 = scmp.ne.s32.totalorder %s2823_s1, 0  ;;  %s2156_s5 = sshll.u32 %s2251_s19, 4  ;;  %s2157_s5 = int_to_ptr.vmem [resolvable:$false] %s2156_s5 }
  0xd6   : > { %s2158_s20 = scalar_lea.vmem %s2157_s5, 256  ;;  %p2159_p1 = scmp.lt.s32.totalorder %s2702_s26, %s2157_s5 }
  0xd7   : > { %1737 = vmatpush3.bf16.msra.mxu1 %v1921_v9  ;;  %p2154_p2 = pnand %p2153_p9, %p2826_p3  ;;  %p2160_p8 = scmp.lt.s32.totalorder %s2158_s20, %s2152_s29 }
  0xd8   : > { %1748 = vmatprep.subr.bf16.mxu1 %v2244_v0  ;;  %1729 = vmatpush3.bf16.msra.mxu0 %v1923_v10  ;;  %s2700_s28 = scalar_lea.hbm %s2825_s7, %s1675_s24 }
  0xd9   : > { %1742 = vmatprep.subr.bf16.mxu0 %v2244_v0  ;;  %p2155_p5 = pneg %p2154_p2  ;;  %p2161_p4 = por %p2160_p8, %p2159_p1 }
  0xda   : > { %1739 = vmatmul.mubr.msk.bf16.vlgmr.msra.gmra.mxu1 %vm667_vm1, %v643_v11 }
  0xdb   : > { %1750 = vmatprep.mubr.msk.bf16.mxu1 %vm2245_vm0, %v2244_v0  ;;  %1731 = vmatmul.mubr.msk.bf16.vlgmr.msra.gmra.mxu0 %vm667_vm1, %v642_v12  ;;  %p2162_p13 = pnand %p2161_p4, %p2155_p5 }
  0xdc   : > { %1744 = vmatprep.mubr.msk.bf16.mxu0 %vm2245_vm0, %v2244_v0 }
 0x192   : > { %v772_v14 = vpop.f32.mrf.mxu1  ;;  %v705_v16 = vpop.f32.mrf.mxu0 }
 0x193   : > { %v773_v15 = vadd.f32 %v1650_v13, %v772_v14  ;;  %v706_v23 = vadd.f32 %v1646_v17, %v705_v16 }
 0x194   : > { %v1724_v18 = vpop.f32.mrf.mxu1  ;;  %v1716_v20 = vpop.f32.mrf.mxu0 }
 0x195   : > { %v778_v19 = vpack.c.bf16 %v773_v15, %v773_v15  ;;  %v711_v30 = vpack.c.bf16 %v706_v23, %v706_v23 }
 0x196   : > { %v775_v21 = vpop.f32.mrf.mxu1  ;;  %v708_v24 = vpop.f32.mrf.mxu0 }
 0x197   : > { %v912_v22 = vsel %vm907_vm2, %v778_v19, 0 }
 0x198   : > { %v1725_v25 = vpop.f32.mrf.mxu1  ;;  %1743 = vmatpush3.bf16.xpose.msra.mxu0 %v912_v22  ;;  %v1717_v27 = vpop.f32.mrf.mxu0 }
 0x199   : > { %1754 = vmatprep.subr.bf16.mxu0 %v2244_v0 }
 0x19a   : > { %v900_v28 = vpop.f32.mrf.mxu1 }
 0x19b   : > { %v901_v31 = vadd.f32 %v900_v28, %v850_v26  ;;  %v839_v33 = vpop.f32.mrf.mxu0 }
 0x19c   : > { %v1740_v32 = vpop.f32.mrf.mxu1  ;;  %v840_v35 = vadd.f32 %v1654_v29, %v839_v33 }
 0x19d   : > { %v2635_v34 = vpack.c.bf16 %v901_v31, %v901_v31  ;;  %v1732_v37 = vpop.f32.mrf.mxu0 }
 0x19e   : > { %v903_v36 = vpop.f32.mrf.mxu1  ;;  %v2642_v41 = vpack.c.bf16 %v840_v35, %v840_v35 }
 0x19f   : > { %1745 = vmatmul.mubr.msk.bf16.vlgmr.msra.gmra.mxu0 %vm907_vm2, %v711_v30  ;;  %v955_v38 = vsel %vm907_vm2, %v2635_v34, 0  ;;  %v842_v40 = vpop.f32.mrf.mxu0 }
 0x1a0   : > { %1749 = vmatpush3.bf16.xpose.msra.mxu1 %v955_v38  ;;  %v1741_v39 = vpop.f32.mrf.mxu1  ;;  %1756 = vmatprep.mubr.msk.bf16.mxu0 %vm2245_vm0, %v2244_v0  ;;  %v1089_v43 = vsel %vm1087_vm3, %v2642_v41, 0 }
 0x1a1   : > { %1760 = vmatprep.subr.bf16.mxu1 %v2244_v0  ;;  %v1733_v42 = vpop.f32.mrf.mxu0 }
 0x1a7   : > { %1751 = vmatmul.mubr.msk.bf16.vlgmr.msra.gmra.mxu1 %vm907_vm2, %v711_v30 }
 0x1a8   : > { %1761 = vmatpush3.bf16.msra.mxu1 %v1089_v43  ;;  %1762 = vmatprep.mubr.msk.bf16.mxu1 %vm2245_vm0, %v2244_v0 }
 0x1a9   : > { %1772 = vmatprep.subr.bf16.mxu1 %v2244_v0 }
 0x25f   : > { %v948_v44 = vpop.f32.mrf.mxu0 }
 0x260   : > { %v998_v45 = vsel %vm997_vm4, %v948_v44, -inf }
 0x261   : > { %999 = vmax.xlane.f32.xlu0 %v998_v45  ;;  %v1746_v46 = vpop.f32.mrf.mxu0 }
 0x263   : > { %v951_v47 = vpop.f32.mrf.mxu0 }
 0x265   : > { %v1747_v48 = vpop.f32.mrf.mxu0 }
 0x267   : > { %v991_v49 = vpop.f32.mrf.mxu1 }
 0x269   : > { %v1752_v50 = vpop.f32.mrf.mxu1 }
 0x26b   : > { %v994_v51 = vpop.f32.mrf.mxu1 }
 0x26d   : > { %v1753_v53 = vpop.f32.mrf.mxu1 }
 0x2ea   : > { %v1000_v54 = vpop.xlane.xlu0 %999 }
 0x2eb   : > { %v1001_v55 = vmax.f32 %v1000_v54, %v991_v49 }
 0x2ed   : > { %1004 = vperm.xlu0 %1914, %v1001_v55   ;;  %v1010_v61 = vsub.f32 %v991_v49, %v1001_v55 }
 0x2ef   : > { %v1011_v62 = vmul.f32 1.442695, %v1010_v61 }
 0x368   : > { %v1005_v56 = vpop.permute.xlu0 %1004 }
 0x369   : > { %v1007_v57 = vsub.f32 %v948_v44, %v1005_v56 }
 0x36b   : > { %v1008_v58 = vmul.f32 1.442695, %v1007_v57 }
 0x36d   : > { %1926 = vpow2.f32 %v1008_v58 }
 0x36e   : > { %1928 = vpow2.f32 %v1011_v62 }
 0x37a   : > { %v1927_v59 = vpop.eup %1926 }
 0x37b   : > { %v1013_v60 = vsel %vm997_vm4, %v1927_v59, 0.0  ;;  %v1929_v63 = vpop.eup %1928 }
 0x37c   : > { %1014 = vadd.xlane.f32.xlu1 %v1013_v60 }
 0x38d   : > { %1032 = vrot.lane.b32.xlu1 %v2635_v34, %s2247_s27 }
 0x391   : > { %1138 = vrot.lane.b32.xlu1 %v778_v19, %s2248_s25 }
 0x395   : > { %1135 = vrot.lane.b32.xlu1 %v711_v30, %s2248_s25 }
 0x405   : > { %v1015_v1 = vpop.xlane.xlu1 %1014 }
 0x406   : > { %v1017_v2 = vadd.f32 %v1929_v63, %v1015_v1 }
 0x408   : > { %1930 = vrcp.f32 %v1017_v2 }
 0x409   : > { %v1033_v4 = vpop.permute.xlu1 %1032 }
 0x40a   : > { %v1042_v5 = vand.u32 %v2656_v3, %v1033_v4 }
 0x40c   : > { %1755 = vmatpush3.bf16.msra.mxu0 %v1042_v5 }
 0x40d   : > { %1766 = vmatprep.subr.bf16.mxu0 %v2244_v0  ;;  %v1139_v11 = vpop.permute.xlu1 %1138 }
 0x40e   : > { %v1144_v13 = vsel %vm907_vm2, %v1139_v11, 0 }
 0x411   : > { %v1136_v14 = vpop.permute.xlu1 %1135 }
 0x415   : > { %v1931_v6 = vpop.eup %1930 }
 0x416   : > { %v1019_v7 = vmul.f32 %v1931_v6, %v1017_v2 }
 0x418   : > { %v1020_v8 = vsub.f32 2.0, %v1019_v7 }
 0x41a   : > { %v1021_v9 = vmul.f32 %v1931_v6, %v1020_v8  ;;  %v1924_v6 = vld [vmem:[#allocation15 + $0x8] sm:$0xff]  }
 0x41c   : > { %1024 = vperm.xlu1 %1915, %v1021_v9   ;;  %v1029_v10 = vmul.f32 %v1929_v63, %v1021_v9 }
 0x41e   : > { %v1030_v12 = vpack.c.bf16 %v1029_v10, %v1029_v10 }
 0x420   : > { %1186 = vrot.lane.b32.xlu1 %v2635_v34, %s2248_s25  ;;  %1757 = vmatmul.mubr.msk.bf16.vlgmr.msra.gmra.mxu0 %vm1034_vm6, %v1030_v12 }
 0x421   : > { %1767 = vmatpush3.bf16.xpose.msra.mxu0 %v1144_v13  ;;  %1768 = vmatprep.mubr.msk.bf16.mxu0 %vm2245_vm0, %v2244_v0 }
 0x422   : > { %1778 = vmatprep.subr.bf16.mxu0 %v2244_v0 }
 0x428   : > { %1769 = vmatmul.mubr.msk.bf16.vlgmr.msra.gmra.mxu0 %vm907_vm2, %v1136_v14 }
 0x429   : > { %1780 = vmatprep.mubr.msk.bf16.mxu0 %vm2245_vm0, %v2244_v0 }
 0x497   : > { %v1025_v15 = vpop.permute.xlu1 %1024 }
 0x498   : > { %v1027_v16 = vmul.f32 %v1927_v59, %v1025_v15 }
 0x49a   : > { %v1028_v17 = vpack.c.bf16 %v1027_v16, %v1027_v16 }
 0x49b   : > { %v1187_v18 = vpop.permute.xlu1 %1186 }
 0x49c   : > { %v1189_v19 = vsel %vm907_vm2, %v1187_v18, 0  ;;  %1763 = vmatmul.mubr.msk.bf16.vlgmr.msra.gmra.mxu1 %vm997_vm4, %v1028_v17 }
 0x49d   : > { %1773 = vmatpush3.bf16.xpose.msra.mxu1 %v1189_v19  ;;  %1774 = vmatprep.mubr.msk.bf16.mxu1 %vm2245_vm0, %v2244_v0 }
 0x49e   : > { %1784 = vmatprep.subr.bf16.mxu1 %v2244_v0 }
 0x4a4   : > { %1775 = vmatmul.mubr.msk.bf16.vlgmr.msra.gmra.mxu1 %vm907_vm2, %v1136_v14 }
 0x4a5   : > { %1786 = vmatprep.mubr.msk.bf16.mxu1 %vm2245_vm0, %v2244_v0 }
 0x4e0   : > { %v1078_v20 = vpop.f32.mrf.mxu0 }
 0x4e2   : > { %v1758_v21 = vpop.f32.mrf.mxu0 }
 0x4e4   : > { %v1081_v22 = vpop.f32.mrf.mxu0 }
 0x4e6   : > { %v1759_v23 = vpop.f32.mrf.mxu0 }
 0x4e8   : > { %v1180_v24 = vpop.f32.mrf.mxu0 }
 0x4e9   : > { %v1231_v25 = vsel %vm997_vm4, %v1180_v24, -inf }
 0x4ea   : > { %1232 = vmax.xlane.f32.xlu1 %v1231_v25  ;;  %v1770_v26 = vpop.f32.mrf.mxu0 }
 0x4ec   : > { %v1183_v27 = vpop.f32.mrf.mxu0 }
 0x4ee   : > { %v1771_v28 = vpop.f32.mrf.mxu0 }
 0x55c   : > { %v1125_v29 = vpop.f32.mrf.mxu1 }
 0x55d   : > { %v1126_v30 = vadd.f32 %v1125_v29, %v1078_v20 }
 0x55e   : > { %v1764_v31 = vpop.f32.mrf.mxu1 }
 0x55f   : > { %v1131_v32 = vpack.c.bf16 %v1126_v30, %v1126_v30 }
 0x560   : > { %v1128_v33 = vpop.f32.mrf.mxu1 }
 0x561   : > { %1133 = vst.msk [vmem:[#allocation2] sm:$0xf] %vm1132_vm7, %v1131_v32 }
 0x562   : > { %v1765_v35 = vpop.f32.mrf.mxu1 }
 0x564   : > { %v1225_v36 = vpop.f32.mrf.mxu1 }
 0x566   : > { %v1776_v37 = vpop.f32.mrf.mxu1 }
 0x568   : > { %v1228_v38 = vpop.f32.mrf.mxu1 }
 0x56a   : > { %v1777_v39 = vpop.f32.mrf.mxu1 }
 0x573   : > { %v1233_v40 = vpop.xlane.xlu1 %1232 }
 0x574   : > { %v1234_v42 = vmax.f32 %v1233_v40, %v1225_v36 }
 0x576   : > { %v1243_v43 = vsub.f32 %v1225_v36, %v1234_v42  ;;  %1237 = vperm.xlu0 %1914, %v1234_v42  }
 0x578   : > { %v1244_v49 = vmul.f32 1.442695, %v1243_v43 }
 0x5f1   : > { %v1238_v44 = vpop.permute.xlu0 %1237 }
 0x5f2   : > { %v1240_v45 = vsub.f32 %v1180_v24, %v1238_v44 }
 0x5f4   : > { %v1241_v46 = vmul.f32 1.442695, %v1240_v45 }
 0x5f6   : > { %1932 = vpow2.f32 %v1241_v46 }
 0x5f7   : > { %1934 = vpow2.f32 %v1244_v49 }
 0x603   : > { %v1933_v47 = vpop.eup %1932 }
 0x604   : > { %v1246_v48 = vsel %vm997_vm4, %v1933_v47, 0.0  ;;  %v1935_v50 = vpop.eup %1934 }
 0x605   : > { %1247 = vadd.xlane.f32.xlu0 %v1246_v48 }
 0x61b   : > { %1264 = vrot.lane.b32.xlu0 %v2635_v34, %s2249_s22 }
 0x68e   : > { %v1248_v51 = vpop.xlane.xlu0 %1247 }
 0x68f   : > { %v1250_v52 = vadd.f32 %v1935_v50, %v1248_v51 }
 0x691   : > { %1936 = vrcp.f32 %v1250_v52 }
 0x692   : > { %v1265_v53 = vpop.permute.xlu0 %1264 }
 0x693   : > { %v1270_v54 = vand.u32 %v1265_v53, %v2656_v3 }
 0x695   : > { %1779 = vmatpush3.bf16.msra.mxu0 %v1270_v54 }
 0x696   : > { %1790 = vmatprep.subr.bf16.mxu0 %v2244_v0 }
 0x69e   : > { %v1937_v55 = vpop.eup %1936 }
 0x69f   : > { %v1252_v56 = vmul.f32 %v1937_v55, %v1250_v52 }
 0x6a1   : > { %v1253_v57 = vsub.f32 2.0, %v1252_v56 }
 0x6a3   : > { %v1254_v58 = vmul.f32 %v1937_v55, %v1253_v57 }
 0x6a5   : > { %1257 = vperm.xlu1 %1915, %v1254_v58   ;;  %v1262_v59 = vmul.f32 %v1935_v50, %v1254_v58 }
 0x6a7   : > { %v1263_v60 = vpack.c.bf16 %v1262_v59, %v1262_v59 }
 0x6a9   : > { %1313 = vrot.lane.b32.xlu1 %v2642_v41, %s2248_s25  ;;  %1781 = vmatmul.mubr.msk.bf16.vlgmr.msra.gmra.mxu0 %vm1034_vm6, %v1263_v60  ;;  %v1925_v41 = vld [vmem:[#allocation15] sm:$0xff]  }
 0x6aa   : > { %1794 = vmatprep.mubr.msk.bf16.mxu0 %vm2245_vm0, %v2244_v0  ;;  %1791 = vmatpush3.bf16.msra.mxu0 %v1924_v6 }
 0x6ab   : > { %1792 = vmatprep.subr.bf16.mxu0 %v2244_v0  ;;  %v1670_v0 = vld [vmem:[%s2824_s4] ss:$0 sm:$0xff] }
 0x6ae   : > { %1793 = vmatpush3.bf16.msra.mxu0 %v1925_v41 }
 0x720   : > { %v1258_v34 = vpop.permute.xlu1 %1257 }
 0x721   : > { %v1260_v61 = vmul.f32 %v1933_v47, %v1258_v34 }
 0x723   : > { %v1261_v1 = vpack.c.bf16 %v1260_v61, %v1260_v61 }
 0x724   : > { %v1314_v62 = vpop.permute.xlu1 %1313 }
 0x725   : > { %v1319_v63 = vsel %vm1087_vm3, %v1314_v62, 0 }
 0x726   : > { %1785 = vmatpush3.bf16.msra.mxu1 %v1319_v63 }
 0x729   : > { %1787 = vmatmul.mubr.msk.bf16.vlgmr.msra.gmra.mxu1 %vm997_vm4, %v1261_v1 }
 0x769   : > { %v1306_v2 = vpop.f32.mrf.mxu0 }
 0x76b   : > { %v1782_v3 = vpop.f32.mrf.mxu0 }
 0x76d   : > { %v1309_v4 = vpop.f32.mrf.mxu0 }
 0x76f   : > { %v1783_v5 = vpop.f32.mrf.mxu0 }
 0x7e9   : > { %v1355_v7 = vpop.f32.mrf.mxu1 }
 0x7ea   : > { %v1356_v8 = vadd.f32 %v1355_v7, %v1306_v2 }
 0x7eb   : > { %v1788_v9 = vpop.f32.mrf.mxu1 }
 0x7ec   : > { %v1678_v10 = vpack.c.bf16 %v1356_v8, %v1356_v8 }
 0x7ed   : > { %v1358_v11 = vpop.f32.mrf.mxu1 }
 0x7ee   : > { %1365 = vrot.lane.b32.xlu1 %v1678_v10, %s2250_s21 }
 0x7ef   : > { %v1789_v12 = vpop.f32.mrf.mxu1 }
 0x860   : > { %v1366_v13 = vpop.permute.xlu1 %1365 }
 0x861   : > { %1369 = vst.msk [vmem:[#allocation2] sm:$0xf] %vm1368_vm8, %v1366_v13 }
 0x868   : > { %v1370_v14 = vld [vmem:[#allocation2] sm:$0xf] }
 0x869   : > { %1795 = vmatmul.mubr.msk.bf16.vlgmr.msra.gmra.mxu0 %vm667_vm1, %v1370_v14 }
 0x929   : > { %v1431_v15 = vpop.f32.mrf.mxu0 }
 0x92a   : > { %v1432_v16 = vadd.f32 %v1670_v0, %v1431_v15 }
 0x92b   : > { %v1796_v17 = vpop.f32.mrf.mxu0 }
 0x92c   : > { %1437 = vst [vmem:[%s635_s17] sm:$0xff] %v1432_v16 }
 0x92d   : > { %v1434_v18 = vpop.f32.mrf.mxu0 }
 0x92e   : > { %2165 = shalt.err (!%p2162_p13)
}
 0x92f   : > { %s2166_s27 = scalar_lea.hbm %s2700_s28, 128  ;;  %s2170_s22 = scalar_lea.hbm %s2825_s7, 256 }
 0x930   : > { %p2167_p10 = scmp.ne.s32.totalorder %s2700_s28, %s2166_s27  ;;  %p2171_p0 = scmp.lt.s32.totalorder %s2700_s28, %s2825_s7 }
 0x931   : > { %p2172_p6 = scmp.lt.s32.totalorder %s2170_s22, %s2166_s27 }
 0x932   : > { %p2168_p11 = pnand %p2167_p10, %p2826_p3 }
 0x933   : > { %p2173_p7 = por %p2172_p6, %p2171_p0 }
 0x934   : > { %p2169_p12 = pneg %p2168_p11 }
 0x936   : > { %p2174_p9 = pnand %p2173_p7, %p2169_p12 }
 0x938   : > { %2177 = shalt.err (!%p2174_p9)
}
 0x939   : > { %1824 = dma.vmem_to_hbm [thread:$0]  (%p2826_p3), %s2702_s26, 128, %s2700_s28, %s1439_s23   ;;  %v1797_v19 = vpop.f32.mrf.mxu0 }
 0x93a PF: > { %s2827_s9 = sld [smem:[#allocation24_spill]] }
 0x93b   : > { %s2828_s11 = sld [smem:[#allocation29_spill]] }
 0x93c   : > { %s2829_s4 = sld [smem:[#allocation25_spill]] }
 0x940   : > { %s1464_s24 = sand.u32 1, %s2827_s9  }
 0x941   : > { %p2830_p2 = scmp.ne.s32.totalorder %s2828_s11, 0  ;;  %s1465_s17 = scalar_lea.sflag [#allocation5], %s1464_s24 }
 0x942   : > { %p2831_p5 = scmp.ge.s32.totalorder %s2829_s4, 2 }
 0x944   : > { %p1853_p1 = pnand %p2831_p5, %p2830_p2 }
 0x946   : > { %p1854_p8 = pneg %p1853_p1 }
 0x948   : > { %2215 = dma.done.wait (%p1854_p8), %s1465_s17, 128  }
 0x949   : > { %2217 = vsyncadd (%p1854_p8), %s1465_s17, 4294967168  ;;  %s2832_s16 = sld [smem:[#allocation26_spill]]  ;;  %s2834_s29 = smov %s2224_s30 }
 0x94a   : > { %s2833_s1 = sld [smem:[#allocation27_spill]]  ;;  %s2835_s30 = smov %s2228_s15 }
 0x94f   : > { %p33_p4 = scmp.ge.s32.totalorder %s2832_s16, 4  }
 0x950   : > { %s2836_s15 = smov %s2833_s1 }
 0x951   :  { %35 = sbr.rel (!%p33_p4) target bundleno = 19 (0x13), region = 168 }
 0x956   :  { %1470 = vsyncpa [#allocation4], 1 }
 0x957   :  { %1472 = vsyncpa [#allocation4 + $0x1], 1 }
 0x958   :  { %1473 = vsyncpa [#allocation7], 1 }
 0x959   :  { %1475 = vsyncpa [#allocation7 + $0x1], 1 }
 0x95a   :  { %1476 = vsyncpa [#allocation10], 1 }
 0x95b   :  { %1477 = vsyncpa [#allocation13], 1 }
 0x95c   :  { %1478 = vsyncpa [#allocation16], 1 }
 0x95d   :  { %1479 = vsyncpa [#allocation5], 1 }
 0x95e   :  { %1481 = vsyncpa [#allocation5 + $0x1], 1 }

// kernel: tpu_custom_call.1
= control target key start
LH: loop header
LB: loop body
LE: loop exit
PB: predicated region body
PF: predicated region fallthrough
CT: control target
= control target key end

     0   :  { %s2743_s0 = inlined_call_operand.hbm [shape: bf16[2,8,32], index: 0, kind: input, shape index: {}]   ;;  %s2744_s1 = inlined_call_operand.hbm [shape: bf16[2,8,32], index: 1, kind: input, shape index: {}]   ;;  %s2745_s2 = inlined_call_operand.hbm [shape: bf16[2,8,32], index: 2, kind: input, shape index: {}]   ;;  %s2746_s3 = inlined_call_operand.vmem [shape: bf16[2,1,32], index: 3, kind: input, shape index: {}]   ;;  %s2747_s4 = inlined_call_operand.hbm [shape: bf16[32,32], index: 4, kind: input, shape index: {}]   ;;  %s2748_s5 = inlined_call_operand.vmem [shape: f32[1,32], index: 5, kind: input, shape index: {}]   ;;  %s2749_s6 = inlined_call_operand.hbm [shape: bf16[32,32], index: 6, kind: input, shape index: {}]   ;;  %s2750_s7 = inlined_call_operand.hbm [shape: f32[1,32], index: 7, kind: input, shape index: {}]   ;;  %s2751_s8 = inlined_call_operand.vmem [shape: bf16[32,64], index: 8, kind: input, shape index: {}]   ;;  %s2752_s9 = inlined_call_operand.vmem [shape: f32[1,64], index: 9, kind: input, shape index: {}]   ;;  %s2753_s10 = inlined_call_operand.hbm [shape: bf16[32,32], index: 10, kind: input, shape index: {}]   ;;  %s2754_s11 = inlined_call_operand.vmem [shape: f32[1,32], index: 11, kind: input, shape index: {}]   ;;  %s2755_s12 = inlined_call_operand.hbm [shape: bf16[32,128], index: 12, kind: input, shape index: {}]   ;;  %s2756_s13 = inlined_call_operand.vmem [shape: f32[1,128], index: 13, kind: input, shape index: {}]   ;;  %s2757_s14 = inlined_call_operand.hbm [shape: f32[2,8,128], index: 14, kind: output, shape index: {}]  }
   0x1   :  { %2781 = sst [smem:[#allocation30_spill]] %s2744_s1 }
   0x2   :  { %2782 = sst [smem:[#allocation31_spill]] %s2747_s4 }
   0x3   :  { %2783 = sst [smem:[#allocation32_spill]] %s2748_s5 }
   0x4   :  { %2784 = sst [smem:[#allocation33_spill]] %s2750_s7 }
   0x5   :  { %2785 = sst [smem:[#allocation34_spill]] %s2752_s9 }
   0x6   :  { %2786 = sst [smem:[#allocation35_spill]] %s2754_s11 }
   0x7   :  { %2787 = sst [smem:[#allocation36_spill]] %s2756_s13 }
   0x8   :  { %2788 = sst [smem:[#allocation37_spill]] %s2757_s14 }
   0x9   :  { %19 = vsyncpa [#allocation4], 0 }
   0xa   :  { %21 = vsyncpa [#allocation4 + $0x1], 0 }
   0xb   :  { %22 = vsyncpa [#allocation7], 0 }
   0xc   :  { %24 = vsyncpa [#allocation7 + $0x1], 0 }
   0xd   :  { %25 = vsyncpa [#allocation10], 0 }
   0xe   :  { %26 = vsyncpa [#allocation13], 0 }
   0xf   :  { %27 = vsyncpa [#allocation16], 0 }
  0x10   :  { %28 = vsyncpa [#allocation5], 0 }
  0x11   :  { %30 = vsyncpa [#allocation5 + $0x1], 0  ;;  %s2327_s29 = smov 0   ;;  %s2329_s30 = smov 0  }
  0x12   :  { %s2331_s15 = smov 0   ;;  %s2333_s16 = smov 0  }
  0x13 LB: > { %2789 = sst [smem:[#allocation24_spill]] %s2220_s29  ;;  %s2234_s17 = smov [#allocation9]   ;;  %s2232_s16 = sphi %s2333_s16, %s2832_s16   ;;  %s2228_s15 = sphi %s2331_s15, %s2836_s15   ;;  %s2224_s30 = sphi %s2329_s30, %s2835_s30   ;;  %s2220_s29 = sphi %s2327_s29, %s2834_s29  }
  0x14   : > { %2790 = sst [smem:[#allocation25_spill]] %s2232_s16  ;;  %s393_s18 = sshll.u32 %s2234_s17, 4  ;;  %s394_s18 = int_to_ptr.vmem [resolvable:$true] %s393_s18 }
  0x15   : > { %s2348_s19 = sadd.s32 4294967295, %s2232_s16   ;;  %p1623_p0 = scmp.ge.s32.totalorder %s2232_s16, 1 }
  0x16   : > { %p2772_p1 = scmp.eq.s32.totalorder %s2348_s19, 0  ;;  %p381_p2 = scmp.lt.s32.totalorder %s2232_s16, 3 }
  0x17   : > { %s2235_s21 = smov [#allocation12]   ;;  %s1949_s25 = scalar_lea.vmem %s394_s18, 256 }
  0x18   : > { %p2353_p3 = pnand %p1623_p0, %p381_p2  ;;  %s423_s22 = sshll.u32 %s2235_s21, 4  ;;  %s424_s22 = int_to_ptr.vmem [resolvable:$true] %s423_s22 }
  0x19   : > { %p1950_p8 = scmp.ne.s32.totalorder %s394_s18, %s1949_s25  ;;  %p1957_p11 = scmp.lt.s32.totalorder %s394_s18, %s394_s18 }
  0x1a   : > { %s2791_s20 = scalar_select %p2353_p3, 1, 0 }
  0x1b   : > { %p1826_p5 = pneg %p2353_p3  ;;  %p1958_p12 = scmp.lt.s32.totalorder %s1949_s25, %s1949_s25 }
  0x1d   : > { %p2362_p6 = pnand %p1826_p5, %p2772_p1  ;;  %p1959_p13 = por %p1958_p12, %p1957_p11 }
  0x1f   : > { %s2792_s23 = scalar_select %p2362_p6, 1, 0 }
  0x20   : > { %p2368_p7 = pneg %p2362_p6 }
  0x22   : > { %s2793_s24 = scalar_select %p2368_p7, 1, 0 }
  0x23   : > { %p1952_p9 = pnand %p1950_p8, %p2368_p7 }
  0x25   : > { %p1953_p10 = pneg %p1952_p9 }
  0x27   : > { %p1960_p0 = pnand %p1959_p13, %p1953_p10 }
  0x29   : > { %1963 = shalt.err (!%p1960_p0)
}
  0x2a   : > { %s2760_s26 = smov 64   ;;  %s2762_s27 = smov 4  }
  0x2b   : > { %s2794_s4 = sld [smem:[#allocation31_spill]]  ;;  %s1975_s21 = scalar_lea.vmem %s424_s22, 16 }
  0x2c   : > { %p1976_p2 = scmp.ne.s32.totalorder %s424_s22, %s1975_s21  ;;  %s1982_s25 = scalar_lea.vmem %s424_s22, 32 }
  0x2d   : > { %p1983_p9 = scmp.lt.s32.totalorder %s424_s22, %s424_s22  ;;  %p1984_p10 = scmp.lt.s32.totalorder %s1982_s25, %s1975_s21 }
  0x2e   : > { %p1978_p5 = pnand %p1976_p2, %p2368_p7 }
  0x2f   : > { %p1985_p11 = por %p1984_p10, %p1983_p9 }
  0x30   : > { %p1979_p8 = pneg %p1978_p5 }
  0x31   : > { %1829 = dma.hbm_to_vmem [thread:$0]  (!%p2362_p6), %s2794_s4, 256, %s394_s18, [#allocation10], %s2760_s26, %s2760_s26, %s2762_s27  }
  0x32   : > { %p1986_p12 = pnand %p1985_p11, %p1979_p8 }
  0x34   : > { %1989 = shalt.err (!%p1986_p12)
}
  0x35   : > { %s2795_s7 = sld [smem:[#allocation33_spill]]  ;;  %s1622_s18 = sadd.s32 4294967294, %s2232_s16  }
  0x36   : > { %s2391_s28 = sadd.s32 1, %s2232_s16   ;;  %s43_s14 = sadd.s32 1, %s2228_s15 }
  0x37   : > { %2796 = sst [smem:[#allocation26_spill]] %s2391_s28  ;;  %s40_s13 = ssub.s32 %s2232_s16, %s2391_s28 }
  0x38   : > { %p41_p13 = scmp.eq.s32.totalorder %s40_s13, 0  ;;  %p50_p0 = scmp.ne.s32.totalorder %s2228_s15, %s2224_s30 }
  0x39   : > { %p51_p2 = scmp.eq.s32.totalorder %s2232_s16, 0  ;;  %p56_p5 = scmp.ne.s32.totalorder %s2224_s30, %s2220_s29 }
  0x3a   : > { %s2402_s17 = scalar_select %p41_p13, %s2228_s15, %s43_s14  }
  0x3b   : > { %1835 = dma.hbm_to_vmem [thread:$0]  (!%p2362_p6), %s2795_s7, 16, %s424_s22, [#allocation13]  }
  0x3c   : > { %2797 = sst [smem:[#allocation27_spill]] %s2402_s17  ;;  %p52_p8 = por %p51_p2, %p50_p0 }
  0x3d   : > { %p2406_p9 = por %p2772_p1, %p56_p5  ;;  %p368_p10 = scmp.eq.s32.totalorder %s2348_s19, 1 }
  0x3e   : > { %p374_p11 = scmp.eq.s32.totalorder %s1622_s18, 1  ;;  %p1861_p12 = scmp.lt.s32.totalorder %s2232_s16, 2 }
  0x3f   : > { %s2798_s21 = scalar_select %p2406_p9, 1, 0 }
  0x40   : > { %s2764_s22 = sand.u32 1, %s2228_s15   ;;  %p2413_p4 = por %p368_p10, %p50_p0 }
  0x41   : > { %p2417_p3 = por %p374_p11, %p56_p5  ;;  %s2423_s14 = sshll.u32 %s2764_s22, 2 }
  0x42   : > { %s2799_s25 = scalar_select %p2413_p4, 1, 0 }
  0x43   : > { %s2801_s13 = scalar_select %p2417_p3, 1, 0 }
  0x44   : > { %2800 = sst [smem:[#allocation28_spill]] %s2799_s25  ;;  %s2426_s26 = sshll.u32 %s2232_s16, 6 }
  0x45   : > { %2802 = sst [smem:[#allocation29_spill]] %s2801_s13  ;;  %p2428_p13 = pnand %p1861_p12, %p52_p8 }
  0x46   : > { %s490_s18 = sand.u32 1, %s2232_s16   ;;  %s2804_s1 = sld [smem:[#allocation30_spill]] }
  0x47   : > { %s494_s22 = scalar_lea.vmem [#allocation6], %s2423_s14  ;;  %s2238_s13 = smov [#allocation11]  }
  0x48   : > { %s501_s28 = sshll.u32 %s494_s22, 4  ;;  %s409_s29 = sshll.u32 %s2238_s13, 4  ;;  %s2440_s28 = int_to_ptr.vmem [resolvable:$true] %s501_s28  ;;  %s410_s29 = int_to_ptr.vmem [resolvable:$true] %s409_s29 }
  0x49   : > { %s2442_s25 = scalar_lea.sflag [#allocation7], %s490_s18  ;;  %p2448_p2 = pneg %p2428_p13 }
  0x4b   : > { %s2805_s16 = scalar_select %p2448_p2, 1, 0 }
  0x4c   : > { %s2437_s17 = scalar_lea.hbm %s2804_s1, %s2426_s26  ;;  %s1995_s22 = scalar_lea.hbm %s2804_s1, 128 }
  0x4d   : > { %s1990_s11 = scalar_lea.hbm %s2437_s17, 64  ;;  %p1996_p10 = scmp.lt.s32.totalorder %s2437_s17, %s2804_s1 }
  0x4e   : > { %p1991_p0 = scmp.ne.s32.totalorder %s2437_s17, %s1990_s11  ;;  %p1997_p11 = scmp.lt.s32.totalorder %s1995_s22, %s1990_s11 }
  0x50   : > { %p1993_p5 = pnand %p2448_p2, %p1991_p0  ;;  %p1998_p12 = por %p1997_p11, %p1996_p10 }
  0x52   : > { %p1994_p8 = pneg %p1993_p5 }
  0x54   : > { %p1999_p1 = pnand %p1998_p12, %p1994_p8 }
  0x56   : > { %2002 = shalt.err (!%p1999_p1)
}
  0x57   : > { %s2003_s13 = scalar_lea.vmem %s2440_s28, 64  ;;  %s2239_s18 = smov [#allocation6]  }
  0x58   : > { %p2004_p3 = scmp.ne.s32.totalorder %s2440_s28, %s2003_s13  ;;  %s2008_s4 = sshll.u32 %s2239_s18, 4  ;;  %s2009_s4 = int_to_ptr.vmem [resolvable:$false] %s2008_s4 }
  0x59   : > { %s2010_s7 = scalar_lea.vmem %s2009_s4, 128  ;;  %p2011_p4 = scmp.lt.s32.totalorder %s2440_s28, %s2009_s4 }
  0x5a   : > { %p2006_p0 = pnand %p2004_p3, %p2448_p2  ;;  %p2012_p9 = scmp.lt.s32.totalorder %s2010_s7, %s2003_s13 }
  0x5c   : > { %p2007_p5 = pneg %p2006_p0  ;;  %p2013_p6 = por %p2012_p9, %p2011_p4 }
  0x5e   : > { %p2014_p7 = pnand %p2013_p6, %p2007_p5 }
  0x60   : > { %2017 = shalt.err (!%p2014_p7)
}
  0x61   : > { %1848 = dma.hbm_to_vmem [thread:$0]  (!%p2428_p13), %s2437_s17, 64, %s2440_s28, %s2442_s25  }
  0x62   : > { %s2029_s5 = scalar_lea.vmem %s410_s29, 256  ;;  %p2806_p3 = scmp.ne.s32.totalorder %s2793_s24, 0 }
  0x63   : > { %p2030_p1 = scmp.ne.s32.totalorder %s410_s29, %s2029_s5  ;;  %p2037_p11 = scmp.lt.s32.totalorder %s410_s29, %s410_s29 }
  0x64   : > { %p2038_p12 = scmp.lt.s32.totalorder %s2029_s5, %s2029_s5 }
  0x65   : > { %p2032_p8 = pnand %p2030_p1, %p2806_p3 }
  0x66   : > { %p2039_p0 = por %p2038_p12, %p2037_p11 }
  0x67   : > { %p2033_p10 = pneg %p2032_p8 }
  0x69   : > { %p2040_p2 = pnand %p2039_p0, %p2033_p10 }
  0x6b   : > { %2043 = shalt.err (!%p2040_p2)
}
  0x6c   : > { %p2807_p4 = scmp.ne.s32.totalorder %s2792_s23, 0  ;;  %s2808_s9 = smov 4  }
  0x6d   : > { %s2809_s11 = smov 64   ;;  %s2240_s28 = smov [#allocation14]  }
  0x6e   : > { %1832 = dma.hbm_to_vmem [thread:$0]  (!%p2807_p4), %s2749_s6, 256, %s410_s29, [#allocation10], %s2809_s11, %s2809_s11, %s2808_s9  }
  0x6f   : > { %s439_s17 = sshll.u32 %s2240_s28, 4  ;;  %s2241_s18 = smov [#allocation15]   ;;  %s440_s17 = int_to_ptr.vmem [resolvable:$true] %s439_s17 }
  0x70   : > { %s455_s4 = sshll.u32 %s2241_s18, 4  ;;  %s2055_s7 = scalar_lea.vmem %s440_s17, 256  ;;  %s456_s4 = int_to_ptr.vmem [resolvable:$true] %s455_s4 }
  0x71   : > { %p2056_p6 = scmp.ne.s32.totalorder %s440_s17, %s2055_s7  ;;  %p2063_p2 = scmp.lt.s32.totalorder %s440_s17, %s440_s17 }
  0x72   : > { %p2064_p5 = scmp.lt.s32.totalorder %s2055_s7, %s2055_s7 }
  0x73   : > { %p2058_p7 = pnand %p2056_p6, %p2806_p3 }
  0x74   : > { %p2065_p1 = por %p2064_p5, %p2063_p2 }
  0x75   : > { %p2059_p9 = pneg %p2058_p7 }
  0x77   : > { %p2066_p8 = pnand %p2065_p1, %p2059_p9 }
  0x79   : > { %2069 = shalt.err (!%p2066_p8)
}
  0x7a   : > { %1838 = dma.hbm_to_vmem [thread:$0]  (!%p2807_p4), %s2753_s10, 256, %s440_s17, [#allocation13], %s2809_s11, %s2809_s11, %s2808_s9  }
  0x7b   : > { %s2081_s22 = scalar_lea.vmem %s456_s4, 256  ;;  %p2089_p0 = scmp.lt.s32.totalorder %s456_s4, %s456_s4 }
  0x7c   : > { %p2082_p10 = scmp.ne.s32.totalorder %s456_s4, %s2081_s22  ;;  %p2090_p6 = scmp.lt.s32.totalorder %s2081_s22, %s2081_s22 }
  0x7e   : > { %p2084_p11 = pnand %p2082_p10, %p2806_p3  ;;  %p2091_p7 = por %p2090_p6, %p2089_p0 }
  0x80   : > { %p2085_p12 = pneg %p2084_p11 }
  0x82   : > { %p2092_p9 = pnand %p2091_p7, %p2085_p12 }
  0x84   : > { %2095 = shalt.err (!%p2092_p9)
}
  0x85   : > { %1841 = dma.hbm_to_vmem [thread:$0]  (!%p2807_p4), %s2755_s12, 256, %s456_s4, [#allocation16], %s2809_s11, %s2809_s11, %s2808_s9  }
  0x86   : > { %s2505_s18 = scalar_lea.hbm %s2743_s0, %s2426_s26  ;;  %s476_s23 = scalar_lea.vmem [#allocation3], %s2423_s14 }
  0x87   : > { %s483_s7 = sshll.u32 %s476_s23, 4  ;;  %s2512_s22 = scalar_lea.hbm %s2745_s2, %s2426_s26  ;;  %s484_s7 = int_to_ptr.vmem [resolvable:$true] %s483_s7 }
  0x88   : > { %s2810_s13 = sand.u32 1, %s2228_s15   ;;  %s2096_s1 = scalar_lea.hbm %s2505_s18, 64 }
  0x89   : > { %s473_s28 = scalar_lea.sflag [#allocation4], %s2810_s13  ;;  %p2097_p3 = scmp.ne.s32.totalorder %s2505_s18, %s2096_s1 }
  0x8a   : > { %p2811_p4 = scmp.ne.s32.totalorder %s2805_s16, 0  ;;  %s2101_s4 = scalar_lea.hbm %s2743_s0, 128 }
  0x8b   : > { %p2102_p1 = scmp.lt.s32.totalorder %s2505_s18, %s2743_s0  ;;  %p2103_p8 = scmp.lt.s32.totalorder %s2101_s4, %s2096_s1 }
  0x8c   : > { %p2099_p2 = pnand %p2097_p3, %p2811_p4 }
  0x8d   : > { %p2104_p10 = por %p2103_p8, %p2102_p1 }
  0x8e   : > { %p2100_p5 = pneg %p2099_p2 }
  0x90   : > { %p2105_p11 = pnand %p2104_p10, %p2100_p5 }
  0x92   : > { %2108 = shalt.err (!%p2105_p11)
}
  0x93   : > { %s2109_s26 = scalar_lea.vmem %s484_s7, 64  ;;  %s2242_s23 = smov [#allocation3]  }
  0x94   : > { %p2110_p12 = scmp.ne.s32.totalorder %s484_s7, %s2109_s26  ;;  %s2114_s29 = sshll.u32 %s2242_s23, 4  ;;  %s2115_s29 = int_to_ptr.vmem [resolvable:$false] %s2114_s29 }
  0x95   : > { %s2116_s5 = scalar_lea.vmem %s2115_s29, 128  ;;  %p2117_p7 = scmp.lt.s32.totalorder %s484_s7, %s2115_s29 }
  0x96   : > { %p2112_p0 = pnand %p2110_p12, %p2811_p4  ;;  %p2118_p9 = scmp.lt.s32.totalorder %s2116_s5, %s2109_s26 }
  0x98   : > { %p2113_p6 = pneg %p2112_p0  ;;  %p2119_p3 = por %p2118_p9, %p2117_p7 }
  0x9a   : > { %p2120_p2 = pnand %p2119_p3, %p2113_p6 }
  0x9c   : > { %2123 = shalt.err (!%p2120_p2)
}
  0x9d   : > { %1845 = dma.hbm_to_vmem [thread:$0]  (!%p2428_p13), %s2505_s18, 64, %s484_s7, %s473_s28  }
  0x9e   : > { %s512_s1 = scalar_lea.vmem [#allocation8], %s2423_s14  ;;  %s2124_s9 = scalar_lea.hbm %s2512_s22, 64 }
  0x9f   : > { %s519_s13 = sshll.u32 %s512_s1, 4  ;;  %p2125_p5 = scmp.ne.s32.totalorder %s2512_s22, %s2124_s9  ;;  %s520_s13 = int_to_ptr.vmem [resolvable:$true] %s519_s13 }
  0xa0   : > { %s2129_s24 = scalar_lea.hbm %s2745_s2, 128  ;;  %p2130_p10 = scmp.lt.s32.totalorder %s2512_s22, %s2745_s2 }
  0xa1   : > { %p2127_p1 = pnand %p2125_p5, %p2811_p4  ;;  %p2131_p11 = scmp.lt.s32.totalorder %s2129_s24, %s2124_s9 }
  0xa3   : > { %p2128_p8 = pneg %p2127_p1  ;;  %p2132_p12 = por %p2131_p11, %p2130_p10 }
  0xa5   : > { %p2133_p0 = pnand %p2132_p12, %p2128_p8 }
  0xa7   : > { %2136 = shalt.err (!%p2133_p0)
}
  0xa8   : > { %s2137_s14 = scalar_lea.vmem %s520_s13, 64  ;;  %s2243_s18 = smov [#allocation8]  }
  0xa9   : > { %p2138_p6 = scmp.ne.s32.totalorder %s520_s13, %s2137_s14  ;;  %s2142_s7 = sshll.u32 %s2243_s18, 4  ;;  %s2143_s7 = int_to_ptr.vmem [resolvable:$false] %s2142_s7 }
  0xaa   : > { %s2144_s28 = scalar_lea.vmem %s2143_s7, 128  ;;  %p2145_p3 = scmp.lt.s32.totalorder %s520_s13, %s2143_s7 }
  0xab   : > { %p2140_p7 = pnand %p2138_p6, %p2811_p4  ;;  %p2146_p2 = scmp.lt.s32.totalorder %s2144_s28, %s2137_s14 }
  0xad   : > { %p2141_p9 = pneg %p2140_p7  ;;  %p2147_p5 = por %p2146_p2, %p2145_p3 }
  0xaf   : > { %p2148_p1 = pnand %p2147_p5, %p2141_p9 }
  0xb1   : > { %2151 = shalt.err (!%p2148_p1)
}
  0xb2   : > { %1851 = dma.hbm_to_vmem [thread:$0]  (!%p2428_p13), %s2512_s22, 64, %s520_s13, %s2442_s25  }
  0xb3   : > { %p2812_p8 = scmp.ne.s32.totalorder %s2791_s20, 0 }
  0xb4   : > { %s2553_s16 = sand.u32 (!%p2812_p8), 1, %s2224_s30   ;;  %p2813_p4 = scmp.ne.s32.totalorder (!%p2812_p8), %s2798_s21, 0 }
  0xb5   : > { %534 = sbr.rel (%p2812_p8) target bundleno = 2362 (0x93a), region = 76  ;;  %s2556_s23 = sshll.u32 (!%p2812_p8), %s2553_s16, 2 }
  0xb6   : > { %s537_s29 = scalar_lea.sflag (!%p2812_p8), [#allocation4], %s2553_s16  ;;  %s540_s5 = scalar_lea.vmem (!%p2812_p8), [#allocation3], %s2556_s23 }
  0xba   : > { %2195 = dma.done.wait (%p2813_p4), %s537_s29, 64  }
  0xbb   : > { %2197 = vsyncadd (%p2813_p4), %s537_s29, 4294967232  ;;  %s545_s20 = sand.u32 1, %s2348_s19   ;;  %s549_s25 = scalar_lea.vmem [#allocation6], %s2556_s23 }
  0xbc   : > { %s546_s27 = scalar_lea.sflag [#allocation7], %s545_s20 }
  0xbd   : > { %2199 = dma.done.wait (%p2813_p4), %s546_s27, 128  }
  0xbe   : > { %2201 = vsyncadd (%p2813_p4), %s546_s27, 4294967168  ;;  %s558_s22 = scalar_lea.vmem [#allocation8], %s2556_s23  ;;  %p2814_p13 = scmp.eq.s32.totalorder %s2348_s19, 0 }
  0xc0   : > { %2203 = dma.done.wait (%p2814_p13), [#allocation10], 512   ;;  %p2815_p10 = pmov %p2814_p13 }
  0xc2   : > { %2205 = vsyncadd (%p2815_p10), [#allocation10], 4294966784  ;;  %p2816_p11 = pmov %p2815_p10 }
  0xc3   : > { %p2817_p12 = pmov %p2815_p10 }
  0xc4   : > { %2207 = dma.done.wait (%p2816_p11), [#allocation13], 272  }
  0xc5   : > { %2209 = vsyncadd (%p2817_p12), [#allocation13], 4294967024  ;;  %p2818_p0 = pmov %p2815_p10 }
  0xc7   : > { %2211 = dma.done.wait (%p2818_p0), [#allocation16], 256   ;;  %p2819_p6 = pmov %p2818_p0 }
  0xc8   : > { %v2244_v0 = vmov 0.0   ;;  %vm2245_vm0 = vmmov 0   ;;  %v1916_v1 = vld [vmem:[#allocation11 + $0x8] sm:$0xff]   ;;  %v1917_v2 = vld [vmem:[#allocation9 + $0x8] sm:$0xff]   ;;  %v1918_v3 = vld [vmem:[#allocation11] sm:$0xff]   ;;  %p636_p7 = scmp.lt.s32.totalorder %s2348_s19, 1 }
  0xc9   : > { %2213 = vsyncadd (%p2819_p6), [#allocation16], 4294967040  ;;  %1718 = vmatprep.subr.bf16.mxu1 %v2244_v0  ;;  %1710 = vmatprep.subr.bf16.mxu0 %v2244_v0  ;;  %v1919_v4 = vld [vmem:[#allocation9] sm:$0xff]   ;;  %vm667_vm1 = vcmask 261120   ;;  %v641_v5 = vld [vmem:[%s549_s25] sm:$0xf] }
  0xca   : > { %1722 = vmatprep.mubr.msk.bf16.mxu1 %vm2245_vm0, %v2244_v0  ;;  %1714 = vmatprep.mubr.msk.bf16.mxu0 %vm2245_vm0, %v2244_v0  ;;  %v1920_v6 = vld [vmem:[%s2751_s8 + $0x8] sm:$0xff]   ;;  %s637_s13 = scalar_select %p636_p7, %s2348_s19, 1  ;;  %v1921_v9 = vld [vmem:[%s2751_s8] sm:$0xff]   ;;  %v642_v12 = vld [vmem:[%s558_s22] sm:$0xf]  ;;  %vm907_vm2 = vcmask 130048  }
  0xcb   : > { %1719 = vmatpush3.bf16.msra.mxu1 %v1916_v1  ;;  %1711 = vmatpush3.bf16.msra.mxu0 %v1917_v2  ;;  %v640_v7 = vld [vmem:[%s540_s5] sm:$0xf]  ;;  %v1650_v13 = vld [vmem:[#allocation12] ss:$0 sm:$0xff]  ;;  %s2820_s18 = sld [smem:[#allocation32_spill]]  ;;  %vm1087_vm3 = vcmask 1043456  }
  0xcc   : > { %1720 = vmatprep.subr.bf16.mxu1 %v2244_v0  ;;  %1712 = vmatprep.subr.bf16.mxu0 %v2244_v0  ;;  %v1922_v8 = vld [vmem:[#allocation14 + $0x8] sm:$0xff]   ;;  %s638_s17 = scalar_lea.vmem %s2746_s3, %s637_s13  ;;  %v1923_v10 = vld [vmem:[#allocation14] sm:$0xff]   ;;  %s2821_s23 = sld [smem:[#allocation34_spill]]  ;;  %vm997_vm4 = vcmask 64512   ;;  %v2246_v52 = vmov 0   ;;  %vm1038_vm5 = vcmask 1040384  }
  0xcd   : > { %v643_v11 = vld [vmem:[%s638_s17] sm:$0x1]  ;;  %s2822_s20 = sld [smem:[#allocation35_spill]]  ;;  %1914 = vset.pattern.permute.xlu0 %v2246_v52  ;;  %1915 = vset.pattern.permute.xlu1 %v2246_v52  ;;  %s2247_s27 = smov 96   ;;  %vm1034_vm6 = vcmask 7168   ;;  %vm1132_vm7 = vcmask 125952  }
  0xce   : > { %s2248_s25 = smov 112   ;;  %s2249_s22 = smov 80   ;;  %vm1368_vm8 = vcmask 257152  }
  0xcf   : > { %1721 = vmatpush3.bf16.msra.mxu1 %v1918_v3  ;;  %1713 = vmatpush3.bf16.msra.mxu0 %v1919_v4  ;;  %v2656_v3 = vsel %vm1038_vm5, 65535, %v2246_v52  ;;  %s2250_s21 = smov 16   ;;  %s2823_s1 = sld [smem:[#allocation28_spill]] }
  0xd0   : > { %1734 = vmatprep.subr.bf16.mxu1 %v2244_v0  ;;  %1726 = vmatprep.subr.bf16.mxu0 %v2244_v0  ;;  %s1645_s13 = sshll.u32 %s2553_s16, 3  ;;  %s2824_s4 = sld [smem:[#allocation36_spill]] }
  0xd1   : > { %v1646_v17 = vld [vmem:[%s2820_s18] ss:$0 sm:$0xff]  ;;  %s1675_s24 = sshll.u32 %s2348_s19, 7  ;;  %s635_s17 = scalar_lea.vmem [#allocation17], %s1645_s13 }
  0xd2   : > { %1723 = vmatmul.mubr.msk.bf16.vlgmr.msra.gmra.mxu1 %vm667_vm1, %v641_v5  ;;  %1715 = vmatmul.mubr.msk.bf16.vlgmr.msra.gmra.mxu0 %vm667_vm1, %v640_v7  ;;  %v850_v26 = vld [vmem:[%s2821_s23] sm:$0x1]  ;;  %s1452_s26 = sshll.u32 %s635_s17, 4  ;;  %s2825_s7 = sld [smem:[#allocation37_spill]]  ;;  %s2702_s26 = int_to_ptr.vmem [resolvable:$true] %s1452_s26 }
  0xd3   : > { %1735 = vmatpush3.bf16.msra.mxu1 %v1920_v6  ;;  %1738 = vmatprep.mubr.msk.bf16.mxu1 %vm2245_vm0, %v2244_v0  ;;  %v1654_v29 = vld [vmem:[%s2822_s20] ss:$0 sm:$0xff]  ;;  %s1439_s23 = scalar_lea.sflag [#allocation5], %s2553_s16  ;;  %s2152_s29 = scalar_lea.vmem %s2702_s26, 128 }
  0xd4   : > { %1736 = vmatprep.subr.bf16.mxu1 %v2244_v0  ;;  %1727 = vmatpush3.bf16.msra.mxu0 %v1922_v8  ;;  %p2153_p9 = scmp.ne.s32.totalorder %s2702_s26, %s2152_s29  ;;  %s2251_s19 = smov [#allocation17]  }
  0xd5   : > { %1730 = vmatprep.mubr.msk.bf16.mxu0 %vm2245_vm0, %v2244_v0  ;;  %1728 = vmatprep.subr.bf16.mxu0 %v2244_v0  ;;  %p2826_p3 = scmp.ne.s32.totalorder %s2823_s1, 0  ;;  %s2156_s5 = sshll.u32 %s2251_s19, 4  ;;  %s2157_s5 = int_to_ptr.vmem [resolvable:$false] %s2156_s5 }
  0xd6   : > { %s2158_s20 = scalar_lea.vmem %s2157_s5, 256  ;;  %p2159_p1 = scmp.lt.s32.totalorder %s2702_s26, %s2157_s5 }
  0xd7   : > { %1737 = vmatpush3.bf16.msra.mxu1 %v1921_v9  ;;  %p2154_p2 = pnand %p2153_p9, %p2826_p3  ;;  %p2160_p8 = scmp.lt.s32.totalorder %s2158_s20, %s2152_s29 }
  0xd8   : > { %1748 = vmatprep.subr.bf16.mxu1 %v2244_v0  ;;  %1729 = vmatpush3.bf16.msra.mxu0 %v1923_v10  ;;  %s2700_s28 = scalar_lea.hbm %s2825_s7, %s1675_s24 }
  0xd9   : > { %1742 = vmatprep.subr.bf16.mxu0 %v2244_v0  ;;  %p2155_p5 = pneg %p2154_p2  ;;  %p2161_p4 = por %p2160_p8, %p2159_p1 }
  0xda   : > { %1739 = vmatmul.mubr.msk.bf16.vlgmr.msra.gmra.mxu1 %vm667_vm1, %v643_v11 }
  0xdb   : > { %1750 = vmatprep.mubr.msk.bf16.mxu1 %vm2245_vm0, %v2244_v0  ;;  %1731 = vmatmul.mubr.msk.bf16.vlgmr.msra.gmra.mxu0 %vm667_vm1, %v642_v12  ;;  %p2162_p13 = pnand %p2161_p4, %p2155_p5 }
  0xdc   : > { %1744 = vmatprep.mubr.msk.bf16.mxu0 %vm2245_vm0, %v2244_v0 }
 0x192   : > { %v772_v14 = vpop.f32.mrf.mxu1  ;;  %v705_v16 = vpop.f32.mrf.mxu0 }
 0x193   : > { %v773_v15 = vadd.f32 %v1650_v13, %v772_v14  ;;  %v706_v23 = vadd.f32 %v1646_v17, %v705_v16 }
 0x194   : > { %v1724_v18 = vpop.f32.mrf.mxu1  ;;  %v1716_v20 = vpop.f32.mrf.mxu0 }
 0x195   : > { %v778_v19 = vpack.c.bf16 %v773_v15, %v773_v15  ;;  %v711_v30 = vpack.c.bf16 %v706_v23, %v706_v23 }
 0x196   : > { %v775_v21 = vpop.f32.mrf.mxu1  ;;  %v708_v24 = vpop.f32.mrf.mxu0 }
 0x197   : > { %v912_v22 = vsel %vm907_vm2, %v778_v19, 0 }
 0x198   : > { %v1725_v25 = vpop.f32.mrf.mxu1  ;;  %1743 = vmatpush3.bf16.xpose.msra.mxu0 %v912_v22  ;;  %v1717_v27 = vpop.f32.mrf.mxu0 }
 0x199   : > { %1754 = vmatprep.subr.bf16.mxu0 %v2244_v0 }
 0x19a   : > { %v900_v28 = vpop.f32.mrf.mxu1 }
 0x19b   : > { %v901_v31 = vadd.f32 %v900_v28, %v850_v26  ;;  %v839_v33 = vpop.f32.mrf.mxu0 }
 0x19c   : > { %v1740_v32 = vpop.f32.mrf.mxu1  ;;  %v840_v35 = vadd.f32 %v1654_v29, %v839_v33 }
 0x19d   : > { %v2635_v34 = vpack.c.bf16 %v901_v31, %v901_v31  ;;  %v1732_v37 = vpop.f32.mrf.mxu0 }
 0x19e   : > { %v903_v36 = vpop.f32.mrf.mxu1  ;;  %v2642_v41 = vpack.c.bf16 %v840_v35, %v840_v35 }
 0x19f   : > { %1745 = vmatmul.mubr.msk.bf16.vlgmr.msra.gmra.mxu0 %vm907_vm2, %v711_v30  ;;  %v955_v38 = vsel %vm907_vm2, %v2635_v34, 0  ;;  %v842_v40 = vpop.f32.mrf.mxu0 }
 0x1a0   : > { %1749 = vmatpush3.bf16.xpose.msra.mxu1 %v955_v38  ;;  %v1741_v39 = vpop.f32.mrf.mxu1  ;;  %1756 = vmatprep.mubr.msk.bf16.mxu0 %vm2245_vm0, %v2244_v0  ;;  %v1089_v43 = vsel %vm1087_vm3, %v2642_v41, 0 }
 0x1a1   : > { %1760 = vmatprep.subr.bf16.mxu1 %v2244_v0  ;;  %v1733_v42 = vpop.f32.mrf.mxu0 }
 0x1a7   : > { %1751 = vmatmul.mubr.msk.bf16.vlgmr.msra.gmra.mxu1 %vm907_vm2, %v711_v30 }
 0x1a8   : > { %1761 = vmatpush3.bf16.msra.mxu1 %v1089_v43  ;;  %1762 = vmatprep.mubr.msk.bf16.mxu1 %vm2245_vm0, %v2244_v0 }
 0x1a9   : > { %1772 = vmatprep.subr.bf16.mxu1 %v2244_v0 }
 0x25f   : > { %v948_v44 = vpop.f32.mrf.mxu0 }
 0x260   : > { %v998_v45 = vsel %vm997_vm4, %v948_v44, -inf }
 0x261   : > { %999 = vmax.xlane.f32.xlu0 %v998_v45  ;;  %v1746_v46 = vpop.f32.mrf.mxu0 }
 0x263   : > { %v951_v47 = vpop.f32.mrf.mxu0 }
 0x265   : > { %v1747_v48 = vpop.f32.mrf.mxu0 }
 0x267   : > { %v991_v49 = vpop.f32.mrf.mxu1 }
 0x269   : > { %v1752_v50 = vpop.f32.mrf.mxu1 }
 0x26b   : > { %v994_v51 = vpop.f32.mrf.mxu1 }
 0x26d   : > { %v1753_v53 = vpop.f32.mrf.mxu1 }
 0x2ea   : > { %v1000_v54 = vpop.xlane.xlu0 %999 }
 0x2eb   : > { %v1001_v55 = vmax.f32 %v1000_v54, %v991_v49 }
 0x2ed   : > { %1004 = vperm.xlu0 %1914, %v1001_v55   ;;  %v1010_v61 = vsub.f32 %v991_v49, %v1001_v55 }
 0x2ef   : > { %v1011_v62 = vmul.f32 1.442695, %v1010_v61 }
 0x368   : > { %v1005_v56 = vpop.permute.xlu0 %1004 }
 0x369   : > { %v1007_v57 = vsub.f32 %v948_v44, %v1005_v56 }
 0x36b   : > { %v1008_v58 = vmul.f32 1.442695, %v1007_v57 }
 0x36d   : > { %1926 = vpow2.f32 %v1008_v58 }
 0x36e   : > { %1928 = vpow2.f32 %v1011_v62 }
 0x37a   : > { %v1927_v59 = vpop.eup %1926 }
 0x37b   : > { %v1013_v60 = vsel %vm997_vm4, %v1927_v59, 0.0  ;;  %v1929_v63 = vpop.eup %1928 }
 0x37c   : > { %1014 = vadd.xlane.f32.xlu1 %v1013_v60 }
 0x38d   : > { %1032 = vrot.lane.b32.xlu1 %v2635_v34, %s2247_s27 }
 0x391   : > { %1138 = vrot.lane.b32.xlu1 %v778_v19, %s2248_s25 }
 0x395   : > { %1135 = vrot.lane.b32.xlu1 %v711_v30, %s2248_s25 }
 0x405   : > { %v1015_v1 = vpop.xlane.xlu1 %1014 }
 0x406   : > { %v1017_v2 = vadd.f32 %v1929_v63, %v1015_v1 }
 0x408   : > { %1930 = vrcp.f32 %v1017_v2 }
 0x409   : > { %v1033_v4 = vpop.permute.xlu1 %1032 }
 0x40a   : > { %v1042_v5 = vand.u32 %v2656_v3, %v1033_v4 }
 0x40c   : > { %1755 = vmatpush3.bf16.msra.mxu0 %v1042_v5 }
 0x40d   : > { %1766 = vmatprep.subr.bf16.mxu0 %v2244_v0  ;;  %v1139_v11 = vpop.permute.xlu1 %1138 }
 0x40e   : > { %v1144_v13 = vsel %vm907_vm2, %v1139_v11, 0 }
 0x411   : > { %v1136_v14 = vpop.permute.xlu1 %1135 }
 0x415   : > { %v1931_v6 = vpop.eup %1930 }
 0x416   : > { %v1019_v7 = vmul.f32 %v1931_v6, %v1017_v2 }
 0x418   : > { %v1020_v8 = vsub.f32 2.0, %v1019_v7 }
 0x41a   : > { %v1021_v9 = vmul.f32 %v1931_v6, %v1020_v8  ;;  %v1924_v6 = vld [vmem:[#allocation15 + $0x8] sm:$0xff]  }
 0x41c   : > { %1024 = vperm.xlu1 %1915, %v1021_v9   ;;  %v1029_v10 = vmul.f32 %v1929_v63, %v1021_v9 }
 0x41e   : > { %v1030_v12 = vpack.c.bf16 %v1029_v10, %v1029_v10 }
 0x420   : > { %1186 = vrot.lane.b32.xlu1 %v2635_v34, %s2248_s25  ;;  %1757 = vmatmul.mubr.msk.bf16.vlgmr.msra.gmra.mxu0 %vm1034_vm6, %v1030_v12 }
 0x421   : > { %1767 = vmatpush3.bf16.xpose.msra.mxu0 %v1144_v13  ;;  %1768 = vmatprep.mubr.msk.bf16.mxu0 %vm2245_vm0, %v2244_v0 }
 0x422   : > { %1778 = vmatprep.subr.bf16.mxu0 %v2244_v0 }
 0x428   : > { %1769 = vmatmul.mubr.msk.bf16.vlgmr.msra.gmra.mxu0 %vm907_vm2, %v1136_v14 }
 0x429   : > { %1780 = vmatprep.mubr.msk.bf16.mxu0 %vm2245_vm0, %v2244_v0 }
 0x497   : > { %v1025_v15 = vpop.permute.xlu1 %1024 }
 0x498   : > { %v1027_v16 = vmul.f32 %v1927_v59, %v1025_v15 }
 0x49a   : > { %v1028_v17 = vpack.c.bf16 %v1027_v16, %v1027_v16 }
 0x49b   : > { %v1187_v18 = vpop.permute.xlu1 %1186 }
 0x49c   : > { %v1189_v19 = vsel %vm907_vm2, %v1187_v18, 0  ;;  %1763 = vmatmul.mubr.msk.bf16.vlgmr.msra.gmra.mxu1 %vm997_vm4, %v1028_v17 }
 0x49d   : > { %1773 = vmatpush3.bf16.xpose.msra.mxu1 %v1189_v19  ;;  %1774 = vmatprep.mubr.msk.bf16.mxu1 %vm2245_vm0, %v2244_v0 }
 0x49e   : > { %1784 = vmatprep.subr.bf16.mxu1 %v2244_v0 }
 0x4a4   : > { %1775 = vmatmul.mubr.msk.bf16.vlgmr.msra.gmra.mxu1 %vm907_vm2, %v1136_v14 }
 0x4a5   : > { %1786 = vmatprep.mubr.msk.bf16.mxu1 %vm2245_vm0, %v2244_v0 }
 0x4e0   : > { %v1078_v20 = vpop.f32.mrf.mxu0 }
 0x4e2   : > { %v1758_v21 = vpop.f32.mrf.mxu0 }
 0x4e4   : > { %v1081_v22 = vpop.f32.mrf.mxu0 }
 0x4e6   : > { %v1759_v23 = vpop.f32.mrf.mxu0 }
 0x4e8   : > { %v1180_v24 = vpop.f32.mrf.mxu0 }
 0x4e9   : > { %v1231_v25 = vsel %vm997_vm4, %v1180_v24, -inf }
 0x4ea   : > { %1232 = vmax.xlane.f32.xlu1 %v1231_v25  ;;  %v1770_v26 = vpop.f32.mrf.mxu0 }
 0x4ec   : > { %v1183_v27 = vpop.f32.mrf.mxu0 }
 0x4ee   : > { %v1771_v28 = vpop.f32.mrf.mxu0 }
 0x55c   : > { %v1125_v29 = vpop.f32.mrf.mxu1 }
 0x55d   : > { %v1126_v30 = vadd.f32 %v1125_v29, %v1078_v20 }
 0x55e   : > { %v1764_v31 = vpop.f32.mrf.mxu1 }
 0x55f   : > { %v1131_v32 = vpack.c.bf16 %v1126_v30, %v1126_v30 }
 0x560   : > { %v1128_v33 = vpop.f32.mrf.mxu1 }
 0x561   : > { %1133 = vst.msk [vmem:[#allocation2] sm:$0xf] %vm1132_vm7, %v1131_v32 }
 0x562   : > { %v1765_v35 = vpop.f32.mrf.mxu1 }
 0x564   : > { %v1225_v36 = vpop.f32.mrf.mxu1 }
 0x566   : > { %v1776_v37 = vpop.f32.mrf.mxu1 }
 0x568   : > { %v1228_v38 = vpop.f32.mrf.mxu1 }
 0x56a   : > { %v1777_v39 = vpop.f32.mrf.mxu1 }
 0x573   : > { %v1233_v40 = vpop.xlane.xlu1 %1232 }
 0x574   : > { %v1234_v42 = vmax.f32 %v1233_v40, %v1225_v36 }
 0x576   : > { %v1243_v43 = vsub.f32 %v1225_v36, %v1234_v42  ;;  %1237 = vperm.xlu0 %1914, %v1234_v42  }
 0x578   : > { %v1244_v49 = vmul.f32 1.442695, %v1243_v43 }
 0x5f1   : > { %v1238_v44 = vpop.permute.xlu0 %1237 }
 0x5f2   : > { %v1240_v45 = vsub.f32 %v1180_v24, %v1238_v44 }
 0x5f4   : > { %v1241_v46 = vmul.f32 1.442695, %v1240_v45 }
 0x5f6   : > { %1932 = vpow2.f32 %v1241_v46 }
 0x5f7   : > { %1934 = vpow2.f32 %v1244_v49 }
 0x603   : > { %v1933_v47 = vpop.eup %1932 }
 0x604   : > { %v1246_v48 = vsel %vm997_vm4, %v1933_v47, 0.0  ;;  %v1935_v50 = vpop.eup %1934 }
 0x605   : > { %1247 = vadd.xlane.f32.xlu0 %v1246_v48 }
 0x61b   : > { %1264 = vrot.lane.b32.xlu0 %v2635_v34, %s2249_s22 }
 0x68e   : > { %v1248_v51 = vpop.xlane.xlu0 %1247 }
 0x68f   : > { %v1250_v52 = vadd.f32 %v1935_v50, %v1248_v51 }
 0x691   : > { %1936 = vrcp.f32 %v1250_v52 }
 0x692   : > { %v1265_v53 = vpop.permute.xlu0 %1264 }
 0x693   : > { %v1270_v54 = vand.u32 %v1265_v53, %v2656_v3 }
 0x695   : > { %1779 = vmatpush3.bf16.msra.mxu0 %v1270_v54 }
 0x696   : > { %1790 = vmatprep.subr.bf16.mxu0 %v2244_v0 }
 0x69e   : > { %v1937_v55 = vpop.eup %1936 }
 0x69f   : > { %v1252_v56 = vmul.f32 %v1937_v55, %v1250_v52 }
 0x6a1   : > { %v1253_v57 = vsub.f32 2.0, %v1252_v56 }
 0x6a3   : > { %v1254_v58 = vmul.f32 %v1937_v55, %v1253_v57 }
 0x6a5   : > { %1257 = vperm.xlu1 %1915, %v1254_v58   ;;  %v1262_v59 = vmul.f32 %v1935_v50, %v1254_v58 }
 0x6a7   : > { %v1263_v60 = vpack.c.bf16 %v1262_v59, %v1262_v59 }
 0x6a9   : > { %1313 = vrot.lane.b32.xlu1 %v2642_v41, %s2248_s25  ;;  %1781 = vmatmul.mubr.msk.bf16.vlgmr.msra.gmra.mxu0 %vm1034_vm6, %v1263_v60  ;;  %v1925_v41 = vld [vmem:[#allocation15] sm:$0xff]  }
 0x6aa   : > { %1794 = vmatprep.mubr.msk.bf16.mxu0 %vm2245_vm0, %v2244_v0  ;;  %1791 = vmatpush3.bf16.msra.mxu0 %v1924_v6 }
 0x6ab   : > { %1792 = vmatprep.subr.bf16.mxu0 %v2244_v0  ;;  %v1670_v0 = vld [vmem:[%s2824_s4] ss:$0 sm:$0xff] }
 0x6ae   : > { %1793 = vmatpush3.bf16.msra.mxu0 %v1925_v41 }
 0x720   : > { %v1258_v34 = vpop.permute.xlu1 %1257 }
 0x721   : > { %v1260_v61 = vmul.f32 %v1933_v47, %v1258_v34 }
 0x723   : > { %v1261_v1 = vpack.c.bf16 %v1260_v61, %v1260_v61 }
 0x724   : > { %v1314_v62 = vpop.permute.xlu1 %1313 }
 0x725   : > { %v1319_v63 = vsel %vm1087_vm3, %v1314_v62, 0 }
 0x726   : > { %1785 = vmatpush3.bf16.msra.mxu1 %v1319_v63 }
 0x729   : > { %1787 = vmatmul.mubr.msk.bf16.vlgmr.msra.gmra.mxu1 %vm997_vm4, %v1261_v1 }
 0x769   : > { %v1306_v2 = vpop.f32.mrf.mxu0 }
 0x76b   : > { %v1782_v3 = vpop.f32.mrf.mxu0 }
 0x76d   : > { %v1309_v4 = vpop.f32.mrf.mxu0 }
 0x76f   : > { %v1783_v5 = vpop.f32.mrf.mxu0 }
 0x7e9   : > { %v1355_v7 = vpop.f32.mrf.mxu1 }
 0x7ea   : > { %v1356_v8 = vadd.f32 %v1355_v7, %v1306_v2 }
 0x7eb   : > { %v1788_v9 = vpop.f32.mrf.mxu1 }
 0x7ec   : > { %v1678_v10 = vpack.c.bf16 %v1356_v8, %v1356_v8 }
 0x7ed   : > { %v1358_v11 = vpop.f32.mrf.mxu1 }
 0x7ee   : > { %1365 = vrot.lane.b32.xlu1 %v1678_v10, %s2250_s21 }
 0x7ef   : > { %v1789_v12 = vpop.f32.mrf.mxu1 }
 0x860   : > { %v1366_v13 = vpop.permute.xlu1 %1365 }
 0x861   : > { %1369 = vst.msk [vmem:[#allocation2] sm:$0xf] %vm1368_vm8, %v1366_v13 }
 0x868   : > { %v1370_v14 = vld [vmem:[#allocation2] sm:$0xf] }
 0x869   : > { %1795 = vmatmul.mubr.msk.bf16.vlgmr.msra.gmra.mxu0 %vm667_vm1, %v1370_v14 }
 0x929   : > { %v1431_v15 = vpop.f32.mrf.mxu0 }
 0x92a   : > { %v1432_v16 = vadd.f32 %v1670_v0, %v1431_v15 }
 0x92b   : > { %v1796_v17 = vpop.f32.mrf.mxu0 }
 0x92c   : > { %1437 = vst [vmem:[%s635_s17] sm:$0xff] %v1432_v16 }
 0x92d   : > { %v1434_v18 = vpop.f32.mrf.mxu0 }
 0x92e   : > { %2165 = shalt.err (!%p2162_p13)
}
 0x92f   : > { %s2166_s27 = scalar_lea.hbm %s2700_s28, 128  ;;  %s2170_s22 = scalar_lea.hbm %s2825_s7, 256 }
 0x930   : > { %p2167_p10 = scmp.ne.s32.totalorder %s2700_s28, %s2166_s27  ;;  %p2171_p0 = scmp.lt.s32.totalorder %s2700_s28, %s2825_s7 }
 0x931   : > { %p2172_p6 = scmp.lt.s32.totalorder %s2170_s22, %s2166_s27 }
 0x932   : > { %p2168_p11 = pnand %p2167_p10, %p2826_p3 }
 0x933   : > { %p2173_p7 = por %p2172_p6, %p2171_p0 }
 0x934   : > { %p2169_p12 = pneg %p2168_p11 }
 0x936   : > { %p2174_p9 = pnand %p2173_p7, %p2169_p12 }
 0x938   : > { %2177 = shalt.err (!%p2174_p9)
}
 0x939   : > { %1824 = dma.vmem_to_hbm [thread:$0]  (%p2826_p3), %s2702_s26, 128, %s2700_s28, %s1439_s23   ;;  %v1797_v19 = vpop.f32.mrf.mxu0 }
 0x93a PF: > { %s2827_s9 = sld [smem:[#allocation24_spill]] }
 0x93b   : > { %s2828_s11 = sld [smem:[#allocation29_spill]] }
 0x93c   : > { %s2829_s4 = sld [smem:[#allocation25_spill]] }
 0x940   : > { %s1464_s24 = sand.u32 1, %s2827_s9  }
 0x941   : > { %p2830_p2 = scmp.ne.s32.totalorder %s2828_s11, 0  ;;  %s1465_s17 = scalar_lea.sflag [#allocation5], %s1464_s24 }
 0x942   : > { %p2831_p5 = scmp.ge.s32.totalorder %s2829_s4, 2 }
 0x944   : > { %p1853_p1 = pnand %p2831_p5, %p2830_p2 }
 0x946   : > { %p1854_p8 = pneg %p1853_p1 }
 0x948   : > { %2215 = dma.done.wait (%p1854_p8), %s1465_s17, 128  }
 0x949   : > { %2217 = vsyncadd (%p1854_p8), %s1465_s17, 4294967168  ;;  %s2832_s16 = sld [smem:[#allocation26_spill]]  ;;  %s2834_s29 = smov %s2224_s30 }
 0x94a   : > { %s2833_s1 = sld [smem:[#allocation27_spill]]  ;;  %s2835_s30 = smov %s2228_s15 }
 0x94f   : > { %p33_p4 = scmp.ge.s32.totalorder %s2832_s16, 4  }
 0x950   : > { %s2836_s15 = smov %s2833_s1 }
 0x951   :  { %35 = sbr.rel (!%p33_p4) target bundleno = 19 (0x13), region = 168 }
 0x956   :  { %1470 = vsyncpa [#allocation4], 1 }
 0x957   :  { %1472 = vsyncpa [#allocation4 + $0x1], 1 }
 0x958   :  { %1473 = vsyncpa [#allocation7], 1 }
 0x959   :  { %1475 = vsyncpa [#allocation7 + $0x1], 1 }
 0x95a   :  { %1476 = vsyncpa [#allocation10], 1 }
 0x95b   :  { %1477 = vsyncpa [#allocation13], 1 }
 0x95c   :  { %1478 = vsyncpa [#allocation16], 1 }
 0x95d   :  { %1479 = vsyncpa [#allocation5], 1 }
 0x95e   :  { %1481 = vsyncpa [#allocation5 + $0x1], 1 }

</bundles_post_ra>
